<compile_context>
chip_gen: v6e
topology: v6e:2x2x1
jax: 0.10.0
libtpu: 0.0.40
codegen_flags: <defaults>
</compile_context>

<pallas_src>
import functools

import jax
import jax.numpy as jnp
from jax.experimental import pallas as pl
from jax.experimental.pallas import tpu as pltpu

_EPS = 1e-5
_LANES = 128
_PASS1_MAX_ROWS = 2048     # output rows (TH*W) per pass-1 grid step
_PASS2_MAX_ROWS = 4096     # rows of the flattened (M, Cp) map per pass-2 step


def _round_up(x, m):
    return (x + m - 1) // m * m


def _pick_row_block(n, h, w):
    """Largest divisor `th` of `h` with (th*w) % 8 == 0 and th*w <= budget.

    Prefers leaving >= 2 total grid steps so both v7x TensorCores get work.
    """
    feasible = [d for d in range(1, h + 1)
                if h % d == 0 and (d * w) % 8 == 0]
    # TODO(synk): ragged tiles (no divisor of H giving an 8-aligned row count)
    # would need masked stores; not required for this module's shapes.
    assert feasible, "no 8-aligned row block divides H"
    small_enough = [d for d in feasible if d * w <= _PASS1_MAX_ROWS]
    th = max(small_enough) if small_enough else min(feasible)
    if n * (h // th) < 2:                      # keep both v7x TCs busy
        smaller = [d for d in feasible if d < th]
        if smaller:
            th = max(smaller)
    return th


# ---------------------------------------------------------------------------
# Pass 1: in-kernel im2col + MXU matmul (conv) + per-tile centred BN partials
# ---------------------------------------------------------------------------
def _conv_stats_kernel(x_ref, w_ref, conv_ref, stats_ref, *, th, w, cin):
    """x_ref    : (1, th+2, w+2, cin)  bf16 halo'd NHWC input slab
       w_ref    : (9*cin, Cp)          bf16 tap-folded weight (Cout lane-padded)
       conv_ref : (th*w, Cp)           bf16 raw conv output tile
       stats_ref: (8, Cp)   f32; row0 = sum, row1 = centred sum-of-squares
                             (rows 2..7 are unused -> left as-is, never read)
    """
    x = x_ref[0]                                           # (th+2, w+2, cin)
    taps = [x[kh:kh + th, kw:kw + w, :]                    # 9 x (th, w, cin)
            for kh in range(3) for kw in range(3)]
    cols = jnp.concatenate(taps, axis=-1).reshape(th * w, 9 * cin)
    acc = jnp.dot(cols, w_ref[...], preferred_element_type=jnp.float32)
    conv_ref[...] = acc.astype(conv_ref.dtype)             # bf16 writeback

    ssum = jnp.sum(acc, axis=0, keepdims=True)             # (1, Cp) f32
    mu = ssum * (1.0 / (th * w))
    d = acc - mu
    stats_ref[0:1, :] = ssum
    stats_ref[1:2, :] = jnp.sum(d * d, axis=0, keepdims=True)


# ---------------------------------------------------------------------------
# Pass 2: normalize with precomputed scale/shift + ReLU (lane-dense store)
# ---------------------------------------------------------------------------
def _bn_relu_kernel(conv_ref, scale_ref, shift_ref, o_ref):
    y = conv_ref[...].astype(jnp.float32) * scale_ref[...] + shift_ref[...]
    o_ref[...] = jnp.maximum(y, 0.0).astype(o_ref.dtype)


def basic_conv_block(x_nchw, weight, gamma, beta, *,
                     padding=1, stride=1, dilation=1):
    """x_nchw : (N, Cin, H, W)  float32 (PyTorch NCHW)
       weight : (Cout, Cin, 3, 3)
       gamma  : (Cout,)  BN weight        beta : (Cout,)  BN bias
       returns: (N, Cout, H, W)
    """
    # TODO(synk): only the module defaults (3x3, stride=1, pad=1, dil=1) are
    # implemented in the kernels.
    assert stride == 1 and dilation == 1 and padding == 1
    N, Cin, H, W = x_nchw.shape
    Cout, Cin_w, KH, KW = weight.shape
    assert Cin_w == Cin and KH == 3 and KW == 3

    K = KH * KW * Cin
    Cp = _round_up(Cout, _LANES)
    M = N * H * W
    f32 = jnp.float32
    bf16 = jnp.bfloat16

    TH = _pick_row_block(N, H, W)
    n_h = H // TH
    THW = TH * W
    steps = N * n_h

    # ---- layout prep (XLA): NCHW->NHWC, zero halo, bf16, halo'd row slabs ---
    # TODO(synk): an NHWC end-to-end model removes this transpose and the final
    # NHWC->NCHW transpose (each is a full extra pass over activations).
    x_nhwc = jnp.transpose(x_nchw, (0, 2, 3, 1))
    xp = jnp.pad(x_nhwc, ((0, 0), (1, 1), (1, 1), (0, 0))).astype(bf16)
    if n_h == 1:
        slabs = xp                                        # (N, H+2, W+2, Cin)
    else:
        slabs = jnp.stack([xp[:, hb * TH: hb * TH + TH + 2]
                           for hb in range(n_h)], axis=1)
        slabs = slabs.reshape(steps, TH + 2, W + 2, Cin)

    # (Cout, Cin, 3, 3) -> (3, 3, Cin, Cout) -> (K, Cout) -> lane pad -> bf16
    w2 = jnp.transpose(weight, (2, 3, 1, 0)).reshape(K, Cout)
    w2 = jnp.pad(w2, ((0, 0), (0, Cp - Cout))).astype(bf16)

    kern1 = functools.partial(_conv_stats_kernel, th=TH, w=W, cin=Cin)
    cparams1 = pltpu.CompilerParams(
        dimension_semantics=("parallel", "parallel"),
        vmem_limit_bytes=32 * 1024 * 1024)

    conv_out, stats = pl.pallas_call(
        kern1,
        grid=(N, n_h),
        in_specs=[
            pl.BlockSpec((1, TH + 2, W + 2, Cin),
                         lambda n, hb: (n * n_h + hb, 0, 0, 0)),
            # TODO(synk): for very large Cin/Cout add K/Cout grid blocking and
            # pipeline_mode=pl.Buffered(1) on this constant-index weight block
            # so pass-1 VMEM stays bounded on v7x; unnecessary at these sizes.
            pl.BlockSpec((K, Cp), lambda n, hb: (0, 0)),
        ],
        out_specs=(
            pl.BlockSpec((THW, Cp), lambda n, hb: (n * n_h + hb, 0)),
            pl.BlockSpec((8, Cp), lambda n, hb: (n * n_h + hb, 0)),
        ),
        out_shape=(
            jax.ShapeDtypeStruct((M, Cp), bf16),          # bf16 intermediate
            jax.ShapeDtypeStruct((steps * 8, Cp), f32),
        ),
        compiler_params=cparams1,
        cost_estimate=pl.CostEstimate(
            flops=2 * M * K * Cp, transcendentals=0,
            bytes_accessed=(2 * steps * (TH + 2) * (W + 2) * Cin
                            + 2 * K * Cp + 2 * M * Cp + 4 * steps * 8 * Cp)),
    )(slabs, w2)

    # ---- finalize BN statistics (tiny: steps x Cp, done in XLA) -------------
    st = stats.reshape(steps, 8, Cp)
    sums = st[:, 0, :]                                    # (steps, Cp)
    css = st[:, 1, :]                                     # centred sum-sq
    mean_t = sums / THW
    mean = jnp.sum(sums, axis=0) / M
    ss = jnp.sum(css, axis=0) + THW * jnp.sum((mean_t - mean[None, :]) ** 2,
                                              axis=0)
    var = ss / M                                          # biased (torch fwd)
    inv_std = jax.lax.rsqrt(var + _EPS)
    # NOTE: padded lanes (Cout..Cp) have var == 0 -> inv_std = 1/sqrt(eps);
    # harmless because gamma/beta are zero-padded there and those lanes are
    # sliced away below.  Do not change the pad values without revisiting this.
    gamma_p = jnp.pad(gamma.astype(f32), (0, Cp - Cout))
    beta_p = jnp.pad(beta.astype(f32), (0, Cp - Cout))
    scale = (gamma_p * inv_std).reshape(1, Cp)
    shift = (beta_p - mean * gamma_p * inv_std).reshape(1, Cp)

    # ---- pass 2: its own (larger) tile; purely HBM-bound --------------------
    k2 = 1
    for d in range(steps, 0, -1):
        if steps % d == 0 and THW * d <= _PASS2_MAX_ROWS:
            k2 = d
            break
    TM2 = THW * k2
    n2 = steps // k2
    cparams2 = pltpu.CompilerParams(
        dimension_semantics=("parallel",),
        vmem_limit_bytes=48 * 1024 * 1024)

    out_flat = pl.pallas_call(
        _bn_relu_kernel,
        grid=(n2,),
        in_specs=[pl.BlockSpec((TM2, Cp), lambda i: (i, 0)),
                  pl.BlockSpec((1, Cp), lambda i: (0, 0)),
                  pl.BlockSpec((1, Cp), lambda i: (0, 0))],
        out_specs=pl.BlockSpec((TM2, Cp), lambda i: (i, 0)),
        out_shape=jax.ShapeDtypeStruct((M, Cp), x_nchw.dtype),
        compiler_params=cparams2,
        cost_estimate=pl.CostEstimate(
            flops=2 * M * Cp, transcendentals=0,
            bytes_accessed=2 * M * Cp + 4 * M * Cp + 2 * 4 * Cp),
    )(conv_out, scale, shift)

    out_nhwc = out_flat[:, :Cout].reshape(N, H, W, Cout)
    return jnp.transpose(out_nhwc, (0, 3, 1, 2))          # back to NCHW


def _reference(x_nchw, weight, gamma, beta):
    """Pure-JAX reference (NCHW conv + batch-stat BN + ReLU)."""
    conv = jax.lax.conv_general_dilated(
        x_nchw, weight, window_strides=(1, 1), padding=((1, 1), (1, 1)),
        dimension_numbers=("NCHW", "OIHW", "NCHW"))
    mean = jnp.mean(conv, axis=(0, 2, 3), keepdims=True)
    var = jnp.mean((conv - mean) ** 2, axis=(0, 2, 3), keepdims=True)
    y = (conv - mean) * jax.lax.rsqrt(var + _EPS)
    y = y * gamma[None, :, None, None] + beta[None, :, None, None]
    return jnp.maximum(y, 0.0)


if __name__ == "__main__":
    # Deterministic synthetic parameters (Basic_Conv_Block(in=4, out=8)).
    key = jax.random.PRNGKey(0)
    kx, kw = jax.random.split(key)

    N, Cin, H, W = 2, 4, 16, 16
    Cout = 8

    x = jax.random.normal(kx, (N, Cin, H, W), dtype=jnp.float32)
    weight = 0.1 * jax.random.normal(kw, (Cout, Cin, 3, 3), dtype=jnp.float32)
    gamma = 1.0 + 0.1 * jnp.arange(Cout, dtype=jnp.float32)   # BN weight
    beta = 0.05 * jnp.arange(Cout, dtype=jnp.float32)         # BN bias

    fwd = jax.jit(basic_conv_block)
    out = jax.block_until_ready(fwd(x, weight, gamma, beta))
    assert out.shape == (N, Cout, H, W), out.shape

    ref = jax.block_until_ready(_reference(x, weight, gamma, beta))
    # Tolerances account for bf16 conv operands / intermediate
    # (accumulation and BN statistics are kept in f32).
    if not jnp.allclose(out, ref, rtol=2e-2, atol=2e-2):
        raise AssertionError("Pallas kernel mismatch vs. JAX reference")

    print("KERNEL_OK")
</pallas_src>

<mosaic_0001>
module attributes {stable_mosaic.version = 11 : i64} {
  func.func @_conv_stats_kernel(%arg0: i32, %arg1: i32, %arg2: memref<1x18x18x4xbf16, #tpu.memory_space<vmem>>, %arg3: memref<36x128xbf16, #tpu.memory_space<vmem>>, %arg4: memref<256x128xbf16, #tpu.memory_space<vmem>>, %arg5: memref<8x128xf32, #tpu.memory_space<vmem>>) attributes {dimension_semantics = [#tpu.dimension_semantics<parallel>, #tpu.dimension_semantics<parallel>], iteration_bounds = array<i64: 2, 1>, scalar_prefetch = 0 : i64, scratch_operands = 0 : i64, tpu.core_type = #tpu.core_type<tc>, window_params = [{transform_indices = @transform_0, window_bounds = array<i64: 1, 18, 18, 4>}, {pipeline_mode = #tpu.pipeline_mode<synchronous>, transform_indices = @transform_1, window_bounds = array<i64: 36, 128>}, {transform_indices = @transform_2, window_bounds = array<i64: 256, 128>}, {transform_indices = @transform_3, window_bounds = array<i64: 8, 128>}]} {
    %c0 = arith.constant 0 : index
    %c0_0 = arith.constant 0 : index
    %c0_1 = arith.constant 0 : index
    %c0_2 = arith.constant 0 : index
    %0 = vector.load %arg2[%c0, %c0_0, %c0_1, %c0_2] : memref<1x18x18x4xbf16, #tpu.memory_space<vmem>>, vector<1x18x18x4xbf16>
    %1 = vector.shape_cast %0 : vector<1x18x18x4xbf16> to vector<18x18x4xbf16>
    %2 = vector.extract_strided_slice %1 {offsets = [0, 0, 0], sizes = [16, 16, 4], strides = [1, 1, 1]} : vector<18x18x4xbf16> to vector<16x16x4xbf16>
    %3 = vector.extract_strided_slice %1 {offsets = [0, 1, 0], sizes = [16, 16, 4], strides = [1, 1, 1]} : vector<18x18x4xbf16> to vector<16x16x4xbf16>
    %4 = vector.extract_strided_slice %1 {offsets = [0, 2, 0], sizes = [16, 16, 4], strides = [1, 1, 1]} : vector<18x18x4xbf16> to vector<16x16x4xbf16>
    %5 = vector.extract_strided_slice %1 {offsets = [1, 0, 0], sizes = [16, 16, 4], strides = [1, 1, 1]} : vector<18x18x4xbf16> to vector<16x16x4xbf16>
    %6 = vector.extract_strided_slice %1 {offsets = [1, 1, 0], sizes = [16, 16, 4], strides = [1, 1, 1]} : vector<18x18x4xbf16> to vector<16x16x4xbf16>
    %7 = vector.extract_strided_slice %1 {offsets = [1, 2, 0], sizes = [16, 16, 4], strides = [1, 1, 1]} : vector<18x18x4xbf16> to vector<16x16x4xbf16>
    %8 = vector.extract_strided_slice %1 {offsets = [2, 0, 0], sizes = [16, 16, 4], strides = [1, 1, 1]} : vector<18x18x4xbf16> to vector<16x16x4xbf16>
    %9 = vector.extract_strided_slice %1 {offsets = [2, 1, 0], sizes = [16, 16, 4], strides = [1, 1, 1]} : vector<18x18x4xbf16> to vector<16x16x4xbf16>
    %10 = vector.extract_strided_slice %1 {offsets = [2, 2, 0], sizes = [16, 16, 4], strides = [1, 1, 1]} : vector<18x18x4xbf16> to vector<16x16x4xbf16>
    %11 = tpu.concatenate %2, %3, %4, %5, %6, %7, %8, %9, %10 in 2 : vector<16x16x4xbf16>, vector<16x16x4xbf16>, vector<16x16x4xbf16>, vector<16x16x4xbf16>, vector<16x16x4xbf16>, vector<16x16x4xbf16>, vector<16x16x4xbf16>, vector<16x16x4xbf16>, vector<16x16x4xbf16> -> vector<16x16x36xbf16>
    %12 = vector.shape_cast %11 : vector<16x16x36xbf16> to vector<256x36xbf16>
    %c0_3 = arith.constant 0 : index
    %c0_4 = arith.constant 0 : index
    %13 = vector.load %arg3[%c0_3, %c0_4] : memref<36x128xbf16, #tpu.memory_space<vmem>>, vector<36x128xbf16>
    %cst = arith.constant dense<0.000000e+00> : vector<256x128xf32>
    %14 = tpu.matmul %12, %13, %cst {dimension_numbers = #tpu.dot_dimension_numbers<[1], [0], [0], [1], [0, 0, 1, 1], [], []>} : vector<256x36xbf16>, vector<36x128xbf16>, vector<256x128xf32> -> vector<256x128xf32>
    %15 = arith.truncf %14 : vector<256x128xf32> to vector<256x128xbf16>
    %c0_5 = arith.constant 0 : index
    %c0_6 = arith.constant 0 : index
    %16 = vector.load %arg4[%c0_5, %c0_6] : memref<256x128xbf16, #tpu.memory_space<vmem>>, vector<256x128xbf16>
    tpu.vector_store %arg4[%c0_5, %c0_6], %15 {strides = array<i32>} : memref<256x128xbf16, #tpu.memory_space<vmem>>, vector<256x128xbf16>,
    %cst_7 = arith.constant dense<0.000000e+00> : vector<128xf32>
    %17 = vector.multi_reduction <add>, %14, %cst_7 [0] : vector<256x128xf32> to vector<128xf32>
    %18 = vector.shape_cast %17 : vector<128xf32> to vector<1x128xf32>
    %cst_8 = arith.constant 3.906250e-03 : f32
    %19 = vector.broadcast %cst_8 : f32 to vector<1x128xf32>
    %20 = arith.mulf %18, %19 : vector<1x128xf32>
    %21 = vector.broadcast %20 : vector<1x128xf32> to vector<256x128xf32>
    %22 = arith.subf %14, %21 : vector<256x128xf32>
    %c0_9 = arith.constant 0 : index
    %c0_10 = arith.constant 0 : index
    %23 = vector.load %arg5[%c0_9, %c0_10] : memref<8x128xf32, #tpu.memory_space<vmem>>, vector<1x128xf32>
    tpu.vector_store %arg5[%c0_9, %c0_10], %18 {strides = array<i32>} : memref<8x128xf32, #tpu.memory_space<vmem>>, vector<1x128xf32>,
    %24 = arith.mulf %22, %22 : vector<256x128xf32>
    %cst_11 = arith.constant dense<0.000000e+00> : vector<128xf32>
    %25 = vector.multi_reduction <add>, %24, %cst_11 [0] : vector<256x128xf32> to vector<128xf32>
    %26 = vector.shape_cast %25 : vector<128xf32> to vector<1x128xf32>
    %c1 = arith.constant 1 : index
    %c0_12 = arith.constant 0 : index
    %27 = vector.load %arg5[%c1, %c0_12] : memref<8x128xf32, #tpu.memory_space<vmem>>, vector<1x128xf32>
    tpu.vector_store %arg5[%c1, %c0_12], %26 {strides = array<i32>} : memref<8x128xf32, #tpu.memory_space<vmem>>, vector<1x128xf32>,
    return
  }
  func.func @transform_0(%arg0: i32, %arg1: i32) -> (i32, i32, i32, i32) {
    %c1_i32 = arith.constant 1 : i32
    %0 = arith.muli %arg0, %c1_i32 : i32
    %1 = arith.addi %0, %arg1 : i32
    %c0_i32 = arith.constant 0 : i32
    %c0_i32_0 = arith.constant 0 : i32
    %c0_i32_1 = arith.constant 0 : i32
    %c0_i32_2 = arith.constant 0 : i32
    return %1, %c0_i32, %c0_i32_0, %c0_i32_1 : i32, i32, i32, i32
  }
  func.func @transform_1(%arg0: i32, %arg1: i32) -> (i32, i32) {
    %c0_i32 = arith.constant 0 : i32
    %c0_i32_0 = arith.constant 0 : i32
    %c0_i32_1 = arith.constant 0 : i32
    return %c0_i32, %c0_i32_0 : i32, i32
  }
  func.func @transform_2(%arg0: i32, %arg1: i32) -> (i32, i32) {
    %c1_i32 = arith.constant 1 : i32
    %0 = arith.muli %arg0, %c1_i32 : i32
    %1 = arith.addi %0, %arg1 : i32
    %c0_i32 = arith.constant 0 : i32
    %c0_i32_0 = arith.constant 0 : i32
    return %1, %c0_i32 : i32, i32
  }
  func.func @transform_3(%arg0: i32, %arg1: i32) -> (i32, i32) {
    %c1_i32 = arith.constant 1 : i32
    %0 = arith.muli %arg0, %c1_i32 : i32
    %1 = arith.addi %0, %arg1 : i32
    %c0_i32 = arith.constant 0 : i32
    %c0_i32_0 = arith.constant 0 : i32
    return %1, %c0_i32 : i32, i32
  }
}

module attributes {stable_mosaic.version = 11 : i64} {
  func.func @_bn_relu_kernel(%arg0: i32, %arg1: memref<512x128xbf16, #tpu.memory_space<vmem>>, %arg2: memref<1x128xf32, #tpu.memory_space<vmem>>, %arg3: memref<1x128xf32, #tpu.memory_space<vmem>>, %arg4: memref<512x128xf32, #tpu.memory_space<vmem>>) attributes {dimension_semantics = [#tpu.dimension_semantics<parallel>], iteration_bounds = array<i64: 1>, scalar_prefetch = 0 : i64, scratch_operands = 0 : i64, tpu.core_type = #tpu.core_type<tc>, window_params = [{transform_indices = @transform_0, window_bounds = array<i64: 512, 128>}, {pipeline_mode = #tpu.pipeline_mode<synchronous>, transform_indices = @transform_1, window_bounds = array<i64: 1, 128>}, {pipeline_mode = #tpu.pipeline_mode<synchronous>, transform_indices = @transform_2, window_bounds = array<i64: 1, 128>}, {transform_indices = @transform_3, window_bounds = array<i64: 512, 128>}]} {
    %c0 = arith.constant 0 : index
    %c0_0 = arith.constant 0 : index
    %0 = vector.load %arg1[%c0, %c0_0] : memref<512x128xbf16, #tpu.memory_space<vmem>>, vector<512x128xbf16>
    %1 = arith.extf %0 : vector<512x128xbf16> to vector<512x128xf32>
    %c0_1 = arith.constant 0 : index
    %c0_2 = arith.constant 0 : index
    %2 = vector.load %arg2[%c0_1, %c0_2] : memref<1x128xf32, #tpu.memory_space<vmem>>, vector<1x128xf32>
    %3 = vector.broadcast %2 : vector<1x128xf32> to vector<512x128xf32>
    %4 = arith.mulf %1, %3 : vector<512x128xf32>
    %c0_3 = arith.constant 0 : index
    %c0_4 = arith.constant 0 : index
    %5 = vector.load %arg3[%c0_3, %c0_4] : memref<1x128xf32, #tpu.memory_space<vmem>>, vector<1x128xf32>
    %6 = vector.broadcast %5 : vector<1x128xf32> to vector<512x128xf32>
    %7 = arith.addf %4, %6 : vector<512x128xf32>
    %cst = arith.constant 0.000000e+00 : f32
    %8 = vector.broadcast %cst : f32 to vector<512x128xf32>
    %9 = arith.maximumf %7, %8 : vector<512x128xf32>
    %c0_5 = arith.constant 0 : index
    %c0_6 = arith.constant 0 : index
    %10 = vector.load %arg4[%c0_5, %c0_6] : memref<512x128xf32, #tpu.memory_space<vmem>>, vector<512x128xf32>
    tpu.vector_store %arg4[%c0_5, %c0_6], %9 {strides = array<i32>} : memref<512x128xf32, #tpu.memory_space<vmem>>, vector<512x128xf32>,
    return
  }
  func.func @transform_0(%arg0: i32) -> (i32, i32) {
    %c0_i32 = arith.constant 0 : i32
    %c0_i32_0 = arith.constant 0 : i32
    return %arg0, %c0_i32 : i32, i32
  }
  func.func @transform_1(%arg0: i32) -> (i32, i32) {
    %c0_i32 = arith.constant 0 : i32
    %c0_i32_0 = arith.constant 0 : i32
    %c0_i32_1 = arith.constant 0 : i32
    return %c0_i32, %c0_i32_0 : i32, i32
  }
  func.func @transform_2(%arg0: i32) -> (i32, i32) {
    %c0_i32 = arith.constant 0 : i32
    %c0_i32_0 = arith.constant 0 : i32
    %c0_i32_1 = arith.constant 0 : i32
    return %c0_i32, %c0_i32_0 : i32, i32
  }
  func.func @transform_3(%arg0: i32) -> (i32, i32) {
    %c0_i32 = arith.constant 0 : i32
    %c0_i32_0 = arith.constant 0 : i32
    return %arg0, %c0_i32 : i32, i32
  }
}

</mosaic_0001>

<bundles_post_ra>
// kernel: basic_conv_block.3
= control target key start
LH: loop header
LB: loop body
LE: loop exit
PB: predicated region body
PF: predicated region fallthrough
CT: control target
= control target key end

     0   :  { %s1023_s0 = inlined_call_operand.vmem [shape: bf16[512,128], index: 0, kind: input, shape index: {}]   ;;  %s1024_s1 = inlined_call_operand.vmem [shape: f32[1,128], index: 1, kind: input, shape index: {}]   ;;  %s1025_s2 = inlined_call_operand.vmem [shape: f32[1,128], index: 2, kind: input, shape index: {}]   ;;  %s1026_s3 = inlined_call_operand.vmem [shape: f32[512,128], index: 3, kind: output, shape index: {}]  }
   0x1   :  { %v419_v0 = vld [vmem:[%s1023_s0] sm:$0xff]   ;;  %v546_v4 = vld [vmem:[%s1023_s0 + $0x8] sm:$0xff]   ;;  %v547_v5 = vld [vmem:[%s1023_s0 + $0x10] sm:$0xff]  }
   0x2   :  { %v603_v1 = vld [vmem:[%s1024_s1] ss:$0 sm:$0xff]  ;;  %v420_v2 = vunpack.c.l.bf16 %v419_v0  ;;  %v421_v3 = vunpack.c.h.bf16 %v419_v0  ;;  %v548_v6 = vld [vmem:[%s1023_s0 + $0x18] sm:$0xff]   ;;  %v424_v8 = vunpack.c.l.bf16 %v546_v4  ;;  %v425_v9 = vunpack.c.h.bf16 %v546_v4  ;;  %v550_v33 = vld [vmem:[%s1023_s0 + $0x28] sm:$0xff]  }
   0x3   :  { %v617_v7 = vld [vmem:[%s1025_s2] ss:$0 sm:$0xff]  ;;  %v428_v10 = vunpack.c.l.bf16 %v547_v5  ;;  %v429_v11 = vunpack.c.h.bf16 %v547_v5  ;;  %v432_v14 = vunpack.c.l.bf16 %v548_v6  ;;  %v433_v15 = vunpack.c.h.bf16 %v548_v6  ;;  %v551_v34 = vld [vmem:[%s1023_s0 + $0x30] sm:$0xff]   ;;  %v552_v39 = vld [vmem:[%s1023_s0 + $0x38] sm:$0xff]  }
   0x4   :  { %v149_v12 = vmul.f32 %v420_v2, %v603_v1  ;;  %v150_v13 = vmul.f32 %v421_v3, %v603_v1  ;;  %v151_v16 = vmul.f32 %v424_v8, %v603_v1  ;;  %v152_v17 = vmul.f32 %v425_v9, %v603_v1  ;;  %v549_v28 = vld [vmem:[%s1023_s0 + $0x20] sm:$0xff]   ;;  %v554_v6 = vld [vmem:[%s1023_s0 + $0x48] sm:$0xff]   ;;  %v555_v8 = vld [vmem:[%s1023_s0 + $0x50] sm:$0xff]  }
   0x5   :  { %v153_v18 = vmul.f32 %v428_v10, %v603_v1  ;;  %v154_v19 = vmul.f32 %v429_v11, %v603_v1  ;;  %v155_v22 = vmul.f32 %v432_v14, %v603_v1  ;;  %v156_v23 = vmul.f32 %v433_v15, %v603_v1  ;;  %v553_v0 = vld [vmem:[%s1023_s0 + $0x40] sm:$0xff]  }
   0x6   :  { %v220_v20 = vadd.f32 %v617_v7, %v149_v12  ;;  %v221_v21 = vadd.f32 %v617_v7, %v150_v13  ;;  %v222_v24 = vadd.f32 %v617_v7, %v151_v16  ;;  %v223_v25 = vadd.f32 %v617_v7, %v152_v17  ;;  %v556_v13 = vld [vmem:[%s1023_s0 + $0x58] sm:$0xff]  }
   0x7   :  { %v224_v26 = vadd.f32 %v617_v7, %v153_v18  ;;  %v225_v27 = vadd.f32 %v617_v7, %v154_v19  ;;  %v226_v31 = vadd.f32 %v617_v7, %v155_v22  ;;  %v227_v32 = vadd.f32 %v617_v7, %v156_v23 }
   0x8   :  { %v284_v29 = vmax.f32 %v220_v20, 0.0  ;;  %v285_v30 = vmax.f32 %v221_v21, 0.0  ;;  %v286_v35 = vmax.f32 %v222_v24, 0.0  ;;  %v287_v36 = vmax.f32 %v223_v25, 0.0 }
   0x9   :  { %v288_v37 = vmax.f32 %v224_v26, 0.0  ;;  %v289_v38 = vmax.f32 %v225_v27, 0.0  ;;  %v290_v40 = vmax.f32 %v226_v31, 0.0  ;;  %v291_v41 = vmax.f32 %v227_v32, 0.0 }
   0xa   :  { %348 = vst [vmem:[%s1026_s3] sm:$0xff] %v284_v29  ;;  %349 = vst [vmem:[%s1026_s3 + $0x8] sm:$0xff] %v285_v30  ;;  %v436_v42 = vunpack.c.l.bf16 %v549_v28  ;;  %v437_v43 = vunpack.c.h.bf16 %v549_v28  ;;  %v440_v44 = vunpack.c.l.bf16 %v550_v33  ;;  %v441_v45 = vunpack.c.h.bf16 %v550_v33 }
   0xb   :  { %350 = vst [vmem:[%s1026_s3 + $0x10] sm:$0xff] %v286_v35  ;;  %351 = vst [vmem:[%s1026_s3 + $0x18] sm:$0xff] %v287_v36  ;;  %v444_v46 = vunpack.c.l.bf16 %v551_v34  ;;  %v445_v47 = vunpack.c.h.bf16 %v551_v34  ;;  %v448_v50 = vunpack.c.l.bf16 %v552_v39  ;;  %v449_v51 = vunpack.c.h.bf16 %v552_v39 }
   0xc   :  { %352 = vst [vmem:[%s1026_s3 + $0x20] sm:$0xff] %v288_v37  ;;  %353 = vst [vmem:[%s1026_s3 + $0x28] sm:$0xff] %v289_v38  ;;  %v157_v48 = vmul.f32 %v436_v42, %v603_v1  ;;  %v158_v49 = vmul.f32 %v437_v43, %v603_v1  ;;  %v159_v52 = vmul.f32 %v440_v44, %v603_v1  ;;  %v452_v16 = vunpack.c.l.bf16 %v553_v0  ;;  %v557_v38 = vld [vmem:[%s1023_s0 + $0x60] sm:$0xff]   ;;  %v558_v43 = vld [vmem:[%s1023_s0 + $0x68] sm:$0xff]  }
   0xd   :  { %354 = vst [vmem:[%s1026_s3 + $0x30] sm:$0xff] %v290_v40  ;;  %355 = vst [vmem:[%s1026_s3 + $0x38] sm:$0xff] %v291_v41  ;;  %v160_v53 = vmul.f32 %v441_v45, %v603_v1  ;;  %v161_v54 = vmul.f32 %v444_v46, %v603_v1  ;;  %v162_v55 = vmul.f32 %v445_v47, %v603_v1  ;;  %v453_v17 = vunpack.c.h.bf16 %v553_v0  ;;  %v559_v44 = vld [vmem:[%s1023_s0 + $0x70] sm:$0xff]  }
   0xe   :  { %v228_v56 = vadd.f32 %v617_v7, %v157_v48  ;;  %v229_v57 = vadd.f32 %v617_v7, %v158_v49  ;;  %v163_v58 = vmul.f32 %v448_v50, %v603_v1  ;;  %v164_v59 = vmul.f32 %v449_v51, %v603_v1  ;;  %v560_v49 = vld [vmem:[%s1023_s0 + $0x78] sm:$0xff]  }
   0xf   :  { %v230_v60 = vadd.f32 %v617_v7, %v159_v52  ;;  %v231_v61 = vadd.f32 %v617_v7, %v160_v53  ;;  %v232_v62 = vadd.f32 %v617_v7, %v161_v54  ;;  %v233_v63 = vadd.f32 %v617_v7, %v162_v55 }
  0x10   :  { %v292_v2 = vmax.f32 %v228_v56, 0.0  ;;  %v293_v3 = vmax.f32 %v229_v57, 0.0  ;;  %v234_v4 = vadd.f32 %v617_v7, %v163_v58  ;;  %v235_v5 = vadd.f32 %v617_v7, %v164_v59 }
  0x11   :  { %v294_v9 = vmax.f32 %v230_v60, 0.0  ;;  %v295_v10 = vmax.f32 %v231_v61, 0.0  ;;  %v296_v11 = vmax.f32 %v232_v62, 0.0  ;;  %v297_v12 = vmax.f32 %v233_v63, 0.0 }
  0x12   :  { %356 = vst [vmem:[%s1026_s3 + $0x40] sm:$0xff] %v292_v2  ;;  %357 = vst [vmem:[%s1026_s3 + $0x48] sm:$0xff] %v293_v3  ;;  %v298_v14 = vmax.f32 %v234_v4, 0.0  ;;  %v299_v15 = vmax.f32 %v235_v5, 0.0  ;;  %v456_v18 = vunpack.c.l.bf16 %v554_v6  ;;  %v457_v19 = vunpack.c.h.bf16 %v554_v6 }
  0x13   :  { %358 = vst [vmem:[%s1026_s3 + $0x50] sm:$0xff] %v294_v9  ;;  %359 = vst [vmem:[%s1026_s3 + $0x58] sm:$0xff] %v295_v10  ;;  %v460_v20 = vunpack.c.l.bf16 %v555_v8  ;;  %v461_v21 = vunpack.c.h.bf16 %v555_v8  ;;  %v165_v22 = vmul.f32 %v452_v16, %v603_v1  ;;  %v166_v23 = vmul.f32 %v453_v17, %v603_v1  ;;  %v562_v17 = vld [vmem:[%s1023_s0 + $0x88] sm:$0xff]  }
  0x14   :  { %360 = vst [vmem:[%s1026_s3 + $0x60] sm:$0xff] %v296_v11  ;;  %361 = vst [vmem:[%s1026_s3 + $0x68] sm:$0xff] %v297_v12  ;;  %v464_v24 = vunpack.c.l.bf16 %v556_v13  ;;  %v465_v25 = vunpack.c.h.bf16 %v556_v13  ;;  %v167_v26 = vmul.f32 %v456_v18, %v603_v1  ;;  %v168_v27 = vmul.f32 %v457_v19, %v603_v1  ;;  %v561_v12 = vld [vmem:[%s1023_s0 + $0x80] sm:$0xff]   ;;  %v563_v18 = vld [vmem:[%s1023_s0 + $0x90] sm:$0xff]  }
  0x15   :  { %362 = vst [vmem:[%s1026_s3 + $0x70] sm:$0xff] %v298_v14  ;;  %363 = vst [vmem:[%s1026_s3 + $0x78] sm:$0xff] %v299_v15  ;;  %v169_v28 = vmul.f32 %v460_v20, %v603_v1  ;;  %v170_v29 = vmul.f32 %v461_v21, %v603_v1  ;;  %v236_v30 = vadd.f32 %v617_v7, %v165_v22  ;;  %v468_v52 = vunpack.c.l.bf16 %v557_v38 }
  0x16   :  { %v237_v31 = vadd.f32 %v617_v7, %v166_v23  ;;  %v171_v32 = vmul.f32 %v464_v24, %v603_v1  ;;  %v172_v33 = vmul.f32 %v465_v25, %v603_v1  ;;  %v238_v34 = vadd.f32 %v617_v7, %v167_v26  ;;  %v564_v23 = vld [vmem:[%s1023_s0 + $0x98] sm:$0xff]  }
  0x17   :  { %v239_v35 = vadd.f32 %v617_v7, %v168_v27  ;;  %v240_v36 = vadd.f32 %v617_v7, %v169_v28  ;;  %v241_v37 = vadd.f32 %v617_v7, %v170_v29  ;;  %v300_v39 = vmax.f32 %v236_v30, 0.0 }
  0x18   :  { %v301_v40 = vmax.f32 %v237_v31, 0.0  ;;  %v242_v41 = vadd.f32 %v617_v7, %v171_v32  ;;  %v243_v42 = vadd.f32 %v617_v7, %v172_v33  ;;  %v302_v45 = vmax.f32 %v238_v34, 0.0 }
  0x19   :  { %v303_v46 = vmax.f32 %v239_v35, 0.0  ;;  %v304_v47 = vmax.f32 %v240_v36, 0.0  ;;  %v305_v48 = vmax.f32 %v241_v37, 0.0  ;;  %364 = vst [vmem:[%s1026_s3 + $0x80] sm:$0xff] %v300_v39  ;;  %v469_v53 = vunpack.c.h.bf16 %v557_v38 }
  0x1a   :  { %365 = vst [vmem:[%s1026_s3 + $0x88] sm:$0xff] %v301_v40  ;;  %v306_v50 = vmax.f32 %v242_v41, 0.0  ;;  %v307_v51 = vmax.f32 %v243_v42, 0.0  ;;  %366 = vst [vmem:[%s1026_s3 + $0x90] sm:$0xff] %v302_v45  ;;  %v472_v54 = vunpack.c.l.bf16 %v558_v43  ;;  %v473_v55 = vunpack.c.h.bf16 %v558_v43 }
  0x1b   :  { %367 = vst [vmem:[%s1026_s3 + $0x98] sm:$0xff] %v303_v46  ;;  %368 = vst [vmem:[%s1026_s3 + $0xa0] sm:$0xff] %v304_v47  ;;  %v476_v56 = vunpack.c.l.bf16 %v559_v44  ;;  %v477_v57 = vunpack.c.h.bf16 %v559_v44  ;;  %v173_v58 = vmul.f32 %v468_v52, %v603_v1  ;;  %v174_v59 = vmul.f32 %v469_v53, %v603_v1  ;;  %v566_v53 = vld [vmem:[%s1023_s0 + $0xa8] sm:$0xff]  }
  0x1c   :  { %369 = vst [vmem:[%s1026_s3 + $0xa8] sm:$0xff] %v305_v48  ;;  %370 = vst [vmem:[%s1026_s3 + $0xb0] sm:$0xff] %v306_v50  ;;  %v480_v60 = vunpack.c.l.bf16 %v560_v49  ;;  %v481_v61 = vunpack.c.h.bf16 %v560_v49  ;;  %v175_v62 = vmul.f32 %v472_v54, %v603_v1  ;;  %v176_v63 = vmul.f32 %v473_v55, %v603_v1  ;;  %v565_v48 = vld [vmem:[%s1023_s0 + $0xa0] sm:$0xff]   ;;  %v567_v54 = vld [vmem:[%s1023_s0 + $0xb0] sm:$0xff]  }
  0x1d   :  { %371 = vst [vmem:[%s1026_s3 + $0xb8] sm:$0xff] %v307_v51  ;;  %v177_v0 = vmul.f32 %v476_v56, %v603_v1  ;;  %v178_v2 = vmul.f32 %v477_v57, %v603_v1  ;;  %v244_v3 = vadd.f32 %v617_v7, %v173_v58  ;;  %v245_v4 = vadd.f32 %v617_v7, %v174_v59  ;;  %v568_v59 = vld [vmem:[%s1023_s0 + $0xb8] sm:$0xff]  }
  0x1e   :  { %v179_v5 = vmul.f32 %v480_v60, %v603_v1  ;;  %v180_v6 = vmul.f32 %v481_v61, %v603_v1  ;;  %v246_v8 = vadd.f32 %v617_v7, %v175_v62  ;;  %v247_v9 = vadd.f32 %v617_v7, %v176_v63 }
  0x1f   :  { %v248_v10 = vadd.f32 %v617_v7, %v177_v0  ;;  %v249_v11 = vadd.f32 %v617_v7, %v178_v2  ;;  %v308_v13 = vmax.f32 %v244_v3, 0.0  ;;  %v309_v14 = vmax.f32 %v245_v4, 0.0 }
  0x20   :  { %v250_v15 = vadd.f32 %v617_v7, %v179_v5  ;;  %v251_v16 = vadd.f32 %v617_v7, %v180_v6  ;;  %v310_v19 = vmax.f32 %v246_v8, 0.0  ;;  %v311_v20 = vmax.f32 %v247_v9, 0.0 }
  0x21   :  { %v312_v21 = vmax.f32 %v248_v10, 0.0  ;;  %v313_v22 = vmax.f32 %v249_v11, 0.0  ;;  %372 = vst [vmem:[%s1026_s3 + $0xc0] sm:$0xff] %v308_v13  ;;  %373 = vst [vmem:[%s1026_s3 + $0xc8] sm:$0xff] %v309_v14  ;;  %v484_v26 = vunpack.c.l.bf16 %v561_v12  ;;  %v485_v27 = vunpack.c.h.bf16 %v561_v12 }
  0x22   :  { %v314_v24 = vmax.f32 %v250_v15, 0.0  ;;  %v315_v25 = vmax.f32 %v251_v16, 0.0  ;;  %374 = vst [vmem:[%s1026_s3 + $0xd0] sm:$0xff] %v310_v19  ;;  %375 = vst [vmem:[%s1026_s3 + $0xd8] sm:$0xff] %v311_v20  ;;  %v488_v28 = vunpack.c.l.bf16 %v562_v17  ;;  %v489_v29 = vunpack.c.h.bf16 %v562_v17 }
  0x23   :  { %376 = vst [vmem:[%s1026_s3 + $0xe0] sm:$0xff] %v312_v21  ;;  %377 = vst [vmem:[%s1026_s3 + $0xe8] sm:$0xff] %v313_v22  ;;  %v492_v30 = vunpack.c.l.bf16 %v563_v18  ;;  %v493_v31 = vunpack.c.h.bf16 %v563_v18  ;;  %v181_v32 = vmul.f32 %v484_v26, %v603_v1  ;;  %v182_v33 = vmul.f32 %v485_v27, %v603_v1  ;;  %v569_v22 = vld [vmem:[%s1023_s0 + $0xc0] sm:$0xff]   ;;  %v570_v27 = vld [vmem:[%s1023_s0 + $0xc8] sm:$0xff]  }
  0x24   :  { %378 = vst [vmem:[%s1026_s3 + $0xf0] sm:$0xff] %v314_v24  ;;  %379 = vst [vmem:[%s1026_s3 + $0xf8] sm:$0xff] %v315_v25  ;;  %v496_v34 = vunpack.c.l.bf16 %v564_v23  ;;  %v497_v35 = vunpack.c.h.bf16 %v564_v23  ;;  %v183_v36 = vmul.f32 %v488_v28, %v603_v1  ;;  %v184_v37 = vmul.f32 %v489_v29, %v603_v1  ;;  %v571_v28 = vld [vmem:[%s1023_s0 + $0xd0] sm:$0xff]  }
  0x25   :  { %v185_v38 = vmul.f32 %v492_v30, %v603_v1  ;;  %v186_v39 = vmul.f32 %v493_v31, %v603_v1  ;;  %v252_v40 = vadd.f32 %v617_v7, %v181_v32  ;;  %v253_v41 = vadd.f32 %v617_v7, %v182_v33  ;;  %v572_v33 = vld [vmem:[%s1023_s0 + $0xd8] sm:$0xff]  }
  0x26   :  { %v187_v42 = vmul.f32 %v496_v34, %v603_v1  ;;  %v188_v43 = vmul.f32 %v497_v35, %v603_v1  ;;  %v254_v44 = vadd.f32 %v617_v7, %v183_v36  ;;  %v255_v45 = vadd.f32 %v617_v7, %v184_v37 }
  0x27   :  { %v256_v46 = vadd.f32 %v617_v7, %v185_v38  ;;  %v257_v47 = vadd.f32 %v617_v7, %v186_v39  ;;  %v316_v49 = vmax.f32 %v252_v40, 0.0  ;;  %v317_v50 = vmax.f32 %v253_v41, 0.0 }
  0x28   :  { %v258_v51 = vadd.f32 %v617_v7, %v187_v42  ;;  %v259_v52 = vadd.f32 %v617_v7, %v188_v43  ;;  %v318_v55 = vmax.f32 %v254_v44, 0.0  ;;  %v319_v56 = vmax.f32 %v255_v45, 0.0 }
  0x29   :  { %v320_v57 = vmax.f32 %v256_v46, 0.0  ;;  %v321_v58 = vmax.f32 %v257_v47, 0.0  ;;  %380 = vst [vmem:[%s1026_s3 + $0x100] sm:$0xff] %v316_v49  ;;  %381 = vst [vmem:[%s1026_s3 + $0x108] sm:$0xff] %v317_v50  ;;  %v500_v62 = vunpack.c.l.bf16 %v565_v48  ;;  %v501_v63 = vunpack.c.h.bf16 %v565_v48 }
  0x2a   :  { %v322_v60 = vmax.f32 %v258_v51, 0.0  ;;  %v323_v61 = vmax.f32 %v259_v52, 0.0  ;;  %382 = vst [vmem:[%s1026_s3 + $0x110] sm:$0xff] %v318_v55  ;;  %383 = vst [vmem:[%s1026_s3 + $0x118] sm:$0xff] %v319_v56  ;;  %v504_v0 = vunpack.c.l.bf16 %v566_v53  ;;  %v505_v2 = vunpack.c.h.bf16 %v566_v53 }
  0x2b   :  { %384 = vst [vmem:[%s1026_s3 + $0x120] sm:$0xff] %v320_v57  ;;  %385 = vst [vmem:[%s1026_s3 + $0x128] sm:$0xff] %v321_v58  ;;  %v508_v3 = vunpack.c.l.bf16 %v567_v54  ;;  %v509_v4 = vunpack.c.h.bf16 %v567_v54  ;;  %v189_v5 = vmul.f32 %v500_v62, %v603_v1  ;;  %v190_v6 = vmul.f32 %v501_v63, %v603_v1  ;;  %v573_v58 = vld [vmem:[%s1023_s0 + $0xe0] sm:$0xff]   ;;  %v574_v63 = vld [vmem:[%s1023_s0 + $0xe8] sm:$0xff]  }
  0x2c   :  { %386 = vst [vmem:[%s1026_s3 + $0x130] sm:$0xff] %v322_v60  ;;  %387 = vst [vmem:[%s1026_s3 + $0x138] sm:$0xff] %v323_v61  ;;  %v512_v8 = vunpack.c.l.bf16 %v568_v59  ;;  %v513_v9 = vunpack.c.h.bf16 %v568_v59  ;;  %v191_v10 = vmul.f32 %v504_v0, %v603_v1  ;;  %v192_v11 = vmul.f32 %v505_v2, %v603_v1  ;;  %v575_v0 = vld [vmem:[%s1023_s0 + $0xf0] sm:$0xff]  }
  0x2d   :  { %v193_v12 = vmul.f32 %v508_v3, %v603_v1  ;;  %v194_v13 = vmul.f32 %v509_v4, %v603_v1  ;;  %v260_v14 = vadd.f32 %v617_v7, %v189_v5  ;;  %v261_v15 = vadd.f32 %v617_v7, %v190_v6  ;;  %v576_v6 = vld [vmem:[%s1023_s0 + $0xf8] sm:$0xff]  }
  0x2e   :  { %v195_v16 = vmul.f32 %v512_v8, %v603_v1  ;;  %v196_v17 = vmul.f32 %v513_v9, %v603_v1  ;;  %v262_v18 = vadd.f32 %v617_v7, %v191_v10  ;;  %v263_v19 = vadd.f32 %v617_v7, %v192_v11 }
  0x2f   :  { %v264_v20 = vadd.f32 %v617_v7, %v193_v12  ;;  %v265_v21 = vadd.f32 %v617_v7, %v194_v13  ;;  %v324_v23 = vmax.f32 %v260_v14, 0.0  ;;  %v325_v24 = vmax.f32 %v261_v15, 0.0 }
  0x30   :  { %v266_v25 = vadd.f32 %v617_v7, %v195_v16  ;;  %v267_v26 = vadd.f32 %v617_v7, %v196_v17  ;;  %v326_v29 = vmax.f32 %v262_v18, 0.0  ;;  %v327_v30 = vmax.f32 %v263_v19, 0.0 }
  0x31   :  { %v328_v31 = vmax.f32 %v264_v20, 0.0  ;;  %v329_v32 = vmax.f32 %v265_v21, 0.0  ;;  %388 = vst [vmem:[%s1026_s3 + $0x140] sm:$0xff] %v324_v23  ;;  %389 = vst [vmem:[%s1026_s3 + $0x148] sm:$0xff] %v325_v24  ;;  %v516_v36 = vunpack.c.l.bf16 %v569_v22  ;;  %v517_v37 = vunpack.c.h.bf16 %v569_v22 }
  0x32   :  { %v330_v34 = vmax.f32 %v266_v25, 0.0  ;;  %v331_v35 = vmax.f32 %v267_v26, 0.0  ;;  %390 = vst [vmem:[%s1026_s3 + $0x150] sm:$0xff] %v326_v29  ;;  %391 = vst [vmem:[%s1026_s3 + $0x158] sm:$0xff] %v327_v30  ;;  %v520_v38 = vunpack.c.l.bf16 %v570_v27  ;;  %v521_v39 = vunpack.c.h.bf16 %v570_v27 }
  0x33   :  { %392 = vst [vmem:[%s1026_s3 + $0x160] sm:$0xff] %v328_v31  ;;  %393 = vst [vmem:[%s1026_s3 + $0x168] sm:$0xff] %v329_v32  ;;  %v524_v40 = vunpack.c.l.bf16 %v571_v28  ;;  %v525_v41 = vunpack.c.h.bf16 %v571_v28  ;;  %v197_v42 = vmul.f32 %v516_v36, %v603_v1  ;;  %v198_v43 = vmul.f32 %v517_v37, %v603_v1 }
  0x34   :  { %394 = vst [vmem:[%s1026_s3 + $0x170] sm:$0xff] %v330_v34  ;;  %395 = vst [vmem:[%s1026_s3 + $0x178] sm:$0xff] %v331_v35  ;;  %v528_v44 = vunpack.c.l.bf16 %v572_v33  ;;  %v529_v45 = vunpack.c.h.bf16 %v572_v33  ;;  %v199_v46 = vmul.f32 %v520_v38, %v603_v1  ;;  %v200_v47 = vmul.f32 %v521_v39, %v603_v1 }
  0x35   :  { %v201_v48 = vmul.f32 %v524_v40, %v603_v1  ;;  %v202_v49 = vmul.f32 %v525_v41, %v603_v1  ;;  %v268_v50 = vadd.f32 %v617_v7, %v197_v42  ;;  %v269_v51 = vadd.f32 %v617_v7, %v198_v43 }
  0x36   :  { %v203_v52 = vmul.f32 %v528_v44, %v603_v1  ;;  %v204_v53 = vmul.f32 %v529_v45, %v603_v1  ;;  %v270_v54 = vadd.f32 %v617_v7, %v199_v46  ;;  %v271_v55 = vadd.f32 %v617_v7, %v200_v47 }
  0x37   :  { %v272_v56 = vadd.f32 %v617_v7, %v201_v48  ;;  %v273_v57 = vadd.f32 %v617_v7, %v202_v49  ;;  %v332_v59 = vmax.f32 %v268_v50, 0.0  ;;  %v333_v60 = vmax.f32 %v269_v51, 0.0 }
  0x38   :  { %v274_v61 = vadd.f32 %v617_v7, %v203_v52  ;;  %v275_v62 = vadd.f32 %v617_v7, %v204_v53  ;;  %v334_v2 = vmax.f32 %v270_v54, 0.0  ;;  %v335_v3 = vmax.f32 %v271_v55, 0.0 }
  0x39   :  { %v336_v4 = vmax.f32 %v272_v56, 0.0  ;;  %v337_v5 = vmax.f32 %v273_v57, 0.0  ;;  %396 = vst [vmem:[%s1026_s3 + $0x180] sm:$0xff] %v332_v59  ;;  %397 = vst [vmem:[%s1026_s3 + $0x188] sm:$0xff] %v333_v60  ;;  %v532_v10 = vunpack.c.l.bf16 %v573_v58  ;;  %v533_v11 = vunpack.c.h.bf16 %v573_v58 }
  0x3a   :  { %v338_v8 = vmax.f32 %v274_v61, 0.0  ;;  %v339_v9 = vmax.f32 %v275_v62, 0.0  ;;  %398 = vst [vmem:[%s1026_s3 + $0x190] sm:$0xff] %v334_v2  ;;  %399 = vst [vmem:[%s1026_s3 + $0x198] sm:$0xff] %v335_v3  ;;  %v536_v12 = vunpack.c.l.bf16 %v574_v63  ;;  %v537_v13 = vunpack.c.h.bf16 %v574_v63 }
  0x3b   :  { %400 = vst [vmem:[%s1026_s3 + $0x1a0] sm:$0xff] %v336_v4  ;;  %401 = vst [vmem:[%s1026_s3 + $0x1a8] sm:$0xff] %v337_v5  ;;  %v540_v14 = vunpack.c.l.bf16 %v575_v0  ;;  %v541_v15 = vunpack.c.h.bf16 %v575_v0  ;;  %v205_v16 = vmul.f32 %v532_v10, %v603_v1  ;;  %v206_v17 = vmul.f32 %v533_v11, %v603_v1 }
  0x3c   :  { %402 = vst [vmem:[%s1026_s3 + $0x1b0] sm:$0xff] %v338_v8  ;;  %403 = vst [vmem:[%s1026_s3 + $0x1b8] sm:$0xff] %v339_v9  ;;  %v544_v18 = vunpack.c.l.bf16 %v576_v6  ;;  %v545_v19 = vunpack.c.h.bf16 %v576_v6  ;;  %v207_v20 = vmul.f32 %v536_v12, %v603_v1  ;;  %v208_v21 = vmul.f32 %v537_v13, %v603_v1 }
  0x3d   :  { %v209_v22 = vmul.f32 %v540_v14, %v603_v1  ;;  %v210_v23 = vmul.f32 %v541_v15, %v603_v1  ;;  %v276_v24 = vadd.f32 %v617_v7, %v205_v16  ;;  %v277_v25 = vadd.f32 %v617_v7, %v206_v17 }
  0x3e   :  { %v211_v26 = vmul.f32 %v544_v18, %v603_v1  ;;  %v212_v27 = vmul.f32 %v545_v19, %v603_v1  ;;  %v278_v28 = vadd.f32 %v617_v7, %v207_v20  ;;  %v279_v29 = vadd.f32 %v617_v7, %v208_v21 }
  0x3f   :  { %v280_v30 = vadd.f32 %v617_v7, %v209_v22  ;;  %v281_v31 = vadd.f32 %v617_v7, %v210_v23  ;;  %v340_v32 = vmax.f32 %v276_v24, 0.0  ;;  %v341_v33 = vmax.f32 %v277_v25, 0.0 }
  0x40   :  { %v282_v34 = vadd.f32 %v617_v7, %v211_v26  ;;  %v283_v35 = vadd.f32 %v617_v7, %v212_v27  ;;  %v342_v36 = vmax.f32 %v278_v28, 0.0  ;;  %v343_v37 = vmax.f32 %v279_v29, 0.0 }
  0x41   :  { %v344_v38 = vmax.f32 %v280_v30, 0.0  ;;  %v345_v39 = vmax.f32 %v281_v31, 0.0  ;;  %404 = vst [vmem:[%s1026_s3 + $0x1c0] sm:$0xff] %v340_v32  ;;  %405 = vst [vmem:[%s1026_s3 + $0x1c8] sm:$0xff] %v341_v33 }
  0x42   :  { %v346_v1 = vmax.f32 %v282_v34, 0.0  ;;  %v347_v40 = vmax.f32 %v283_v35, 0.0  ;;  %406 = vst [vmem:[%s1026_s3 + $0x1d0] sm:$0xff] %v342_v36  ;;  %407 = vst [vmem:[%s1026_s3 + $0x1d8] sm:$0xff] %v343_v37 }
  0x43   :  { %408 = vst [vmem:[%s1026_s3 + $0x1e0] sm:$0xff] %v344_v38  ;;  %409 = vst [vmem:[%s1026_s3 + $0x1e8] sm:$0xff] %v345_v39 }
  0x44   :  { %410 = vst [vmem:[%s1026_s3 + $0x1f0] sm:$0xff] %v346_v1  ;;  %411 = vst [vmem:[%s1026_s3 + $0x1f8] sm:$0xff] %v347_v40 }

// kernel: basic_conv_block.2
= control target key start
LH: loop header
LB: loop body
LE: loop exit
PB: predicated region body
PF: predicated region fallthrough
CT: control target
= control target key end

     0   :  { %s2238_s12 = smov 0   ;;  %s2240_s13 = smov 0   ;;  %s2986_s0 = inlined_call_operand.vmem [shape: bf16[2,18,18,4], index: 0, kind: input, shape index: {}]   ;;  %s2987_s1 = inlined_call_operand.vmem [shape: bf16[36,128], index: 1, kind: input, shape index: {}]   ;;  %s2988_s2 = inlined_call_operand.vmem [shape: bf16[512,128], index: 2, kind: output, shape index: {0}]   ;;  %s2989_s3 = inlined_call_operand.vmem [shape: f32[16,128], index: 3, kind: output, shape index: {1}]  }
   0x1   :  { %s2242_s14 = smov 0  }
   0x2 LB: > { %s26_s15 = sadd.s32 1, %s2204_s13  ;;  %p1828_p0 = scmp.ge.s32.totalorder %s2208_s14, 1  ;;  %s2208_s14 = sphi %s2242_s14, %s14_s14   ;;  %s2204_s13 = sphi %s2240_s13, %s2991_s13   ;;  %s2200_s12 = sphi %s2238_s12, %s2990_s12  }
   0x3   : > { %p28_p1 = scmp.ge.s32.totalorder %s26_s15, 2  ;;  %p160_p2 = scmp.lt.s32.totalorder %s2208_s14, 3 }
   0x5   : > { %s2993_s15 = smov (%p28_p1, %s26_s15), 0  ;;  %p161_p3 = pnand %p1828_p0, %p160_p2 }
   0x6   : > { %p192_p4 = scmp.lt.s32.totalorder (!%p161_p3), %s2200_s12, 1  ;;  %s2210_s21 = smov (!%p161_p3), 12  }
   0x7   : > { %164 = sbr.rel (%p161_p3) target bundleno = 685 (0x2ad), region = 28  ;;  %s2211_s22 = smov (!%p161_p3), 20  }
   0x8   : > { %s2212_s23 = smov (!%p161_p3), 8   ;;  %s2213_s24 = smov (!%p161_p3), 4  }
   0x9   : > { %s2214_s25 = smov (!%p161_p3), 16   ;;  %s2215_s26 = smov (!%p161_p3), 24  }
   0xa   : > { %s2216_s27 = smov (!%p161_p3), 28   ;;  %s2217_s5 = smov (!%p161_p3), 32  }
   0xb   : > { %s1830_s8 = sshll.u32 (!%p161_p3), %s2200_s12, 5 }
   0xc   : > { %s2260_s16 = scalar_select %p192_p4, %s2200_s12, 1  ;;  %vm620_vm0 = vcmask 1046528   ;;  %vm395_vm1 = vsmask.f32 7424  ;;  %v2169_v49 = vld [vmem:[%s2987_s1 + $0x8] sm:$0xff]   ;;  %vm1256_vm2 = vcmask 1041408  }
   0xd   : > { %v2167_v45 = vld [vmem:[%s2987_s1 + $0x10] ss:$0 sps:$4 sm:$0x33]   ;;  %v2171_v54 = vld [vmem:[%s2987_s1] sm:$0xff]   ;;  %vm939_vm3 = vcmask 31744   ;;  %vm972_vm4 = vcmask 64512  }
   0xe   : > { %s2114_s17 = smul.u32 216, %s2260_s16  ;;  %2112 = vmatprep.subr.msk.bf16.mxu0 %vm1256_vm2, %v2167_v45  ;;  %v1258_v50 = vsel %vm1256_vm2, %v2167_v45, 0  ;;  %2113 = vmatprep.subr.msk.bf16.mxu1 %vm1256_vm2, %v2167_v45  ;;  %vm1005_vm5 = vcmask 97280   ;;  %vm1038_vm6 = vcmask 130048   ;;  %vm1071_vm7 = vcmask 162816   ;;  %p200_p5 = scmp.lt.s32.totalorder %s1830_s8, 63 }
   0xf   : > { %2069 = vmatpush3.bf16.msra.mxu0 %v1258_v50  ;;  %2109 = vmatpush3.bf16.msra.mxu1 %v1258_v50  ;;  %vm1104_vm8 = vcmask 195584   ;;  %vm1137_vm9 = vcmask 228352   ;;  %vm1170_vm10 = vcmask 261120   ;;  %vm1223_vm11 = vcmask 293888  }
  0x10   : > { %s2266_s20 = scalar_lea.vmem %s2986_s0, %s2114_s17  ;;  %2070 = vmatprep.subr.bf16.mxu0 %v2169_v49  ;;  %2107 = vmatprep.subr.bf16.mxu1 %v2169_v49  ;;  %s2995_s8 = smov (!%p200_p5, %s1830_s8), 63 }
  0x11   : > { %v2269_v0 = vld [vmem:[%s2266_s20 + $0x18] sm:$0xff]   ;;  %v2272_v1 = vld [vmem:[%s2266_s20 + $0xc] sm:$0xff]   ;;  %v2149_v2 = vld [vmem:[%s2266_s20 + $0x14] ss:$0 sps:$4 sm:$0x11]   ;;  %s1831_s9 = sshll.u32 %s2995_s8, 2 }
  0x12   : > { %708 = vrot.lane.b32.xlu1 %v2269_v0, %s2210_s21  ;;  %v2278_v3 = vld [vmem:[%s2266_s20] sm:$0xff]   ;;  %706 = vrot.lane.b32.xlu0 %v2272_v1, %s2210_s21  ;;  %v624_v4 = vrot.slane %v2272_v1, 1  ;;  %v625_v5 = vrot.slane %v2149_v2, 1  ;;  %v2151_v6 = vld [vmem:[%s2266_s20 + $0x8] ss:$0 sps:$4 sm:$0x11]   ;;  %s2741_s12 = scalar_lea.vmem %s2988_s2, %s1831_s9 }
  0x13   : > { %v621_v7 = vrot.slane %v2278_v3, 1  ;;  %v397_v8 = vshrl.u32 %v2278_v3, 16  ;;  %v399_v9 = vshll.u32 %v2278_v3, 16  ;;  %v409_v10 = vshrl.u32 %v2272_v1, 16  ;;  %v2298_v30 = vld [vmem:[%s2266_s20 + $0x24] sm:$0xff]   ;;  %v2325_v48 = vld [vmem:[%s2266_s20 + $0x30] sm:$0xff]   ;;  %2071 = vmatpush3.bf16.msra.mxu0 %v2169_v49  ;;  %2110 = vmatpush3.bf16.msra.mxu1 %v2169_v49 }
  0x14   : > { %v626_v11 = vsel %vm620_vm0, %v624_v4, %v625_v5  ;;  %v622_v12 = vrot.slane %v2151_v6, 1  ;;  %v404_v13 = vshll.u32 %v2151_v6, 16  ;;  %v2152_v14 = vld [vmem:[%s2266_s20 + $0x20] ss:$0 sps:$4 sm:$0x11]   ;;  %v411_v15 = vshll.u32 %v2272_v1, 16  ;;  %2072 = vmatprep.subr.bf16.mxu0 %v2171_v54  ;;  %2108 = vmatprep.subr.bf16.mxu1 %v2171_v54 }
  0x15   : > { %v401_v16 = vrot.slane %v399_v9, 1  ;;  %v416_v17 = vshll.u32 %v2149_v2, 16  ;;  %v423_v18 = vshll.u32 %v2269_v0, 16  ;;  %v627_v23 = vrot.slane %v2269_v0, 1  ;;  %v2344_v60 = vld [vmem:[%s2266_s20 + $0x3c] sm:$0xff]   ;;  %v2420_v49 = vld [vmem:[%s2266_s20 + $0x6c] sm:$0xff]  }
  0x16   : > { %788 = vrot.lane.b32.xlu0 %v626_v11, %s2211_s22  ;;  %v623_v19 = vsel %vm620_vm0, %v621_v7, %v622_v12  ;;  %v406_v20 = vrot.slane %v404_v13, 1  ;;  %v413_v21 = vrot.slane %v411_v15, 1  ;;  %v421_v25 = vshrl.u32 %v2269_v0, 16  ;;  %v2154_v33 = vld [vmem:[%s2266_s20 + $0x2c] ss:$0 sps:$4 sm:$0x11]  }
  0x17   : > { %669 = vrot.lane.b32.xlu1 %v623_v19, %s2212_s23  ;;  %v402_v22 = vor.u32 %v401_v16, %v397_v8  ;;  %v418_v24 = vrot.slane %v416_v17, 1  ;;  %v628_v26 = vrot.slane %v2152_v14, 1  ;;  %v425_v28 = vrot.slane %v423_v18, 1  ;;  %v2156_v52 = vld [vmem:[%s2266_s20 + $0x38] ss:$0 sps:$4 sm:$0x11]   ;;  %2073 = vmatpush3.bf16.msra.mxu0 %v2171_v54 }
  0x18   : > { %v414_v27 = vor.u32 %v413_v21, %v409_v10  ;;  %v428_v29 = vshll.u32 %v2152_v14, 16  ;;  %v435_v37 = vshll.u32 %v2298_v30, 16  ;;  %v433_v39 = vshrl.u32 %v2298_v30, 16  ;;  %2111 = vmatpush3.bf16.msra.mxu1 %v2171_v54  ;;  %v2158_v2 = vld [vmem:[%s2266_s20 + $0x44] ss:$0 sps:$4 sm:$0x11]  }
  0x19   : > { %v407_v31 = vsel %vm395_vm1, %v402_v22, %v406_v20  ;;  %v629_v34 = vsel %vm620_vm0, %v627_v23, %v628_v26  ;;  %v426_v35 = vor.u32 %v425_v28, %v421_v25  ;;  %v440_v41 = vshll.u32 %v2154_v33, 16  ;;  %v2369_v14 = vld [vmem:[%s2266_s20 + $0x48] sm:$0xff]   ;;  %v2160_v16 = vld [vmem:[%s2266_s20 + $0x50] ss:$0 sps:$4 sm:$0x11]   ;;  %v2382_v23 = vld [vmem:[%s2266_s20 + $0x54] sm:$0xff]  }
  0x1a   : > { %588 = vrot.lane.b32.xlu0 %v407_v31, %s2213_s24  ;;  %v419_v32 = vsel %vm395_vm1, %v414_v27, %v418_v24  ;;  %v430_v36 = vrot.slane %v428_v29, 1  ;;  %v437_v40 = vrot.slane %v435_v37, 1  ;;  %v630_v46 = vrot.slane %v2298_v30, 1  ;;  %v2162_v27 = vld [vmem:[%s2266_s20 + $0x5c] ss:$0 sps:$4 sm:$0x11]  }
  0x1b   : > { %671 = vrot.lane.b32.xlu1 %v626_v11, %s2212_s23  ;;  %v442_v43 = vrot.slane %v440_v41, 1  ;;  %v631_v47 = vrot.slane %v2154_v33, 1  ;;  %v447_v53 = vshll.u32 %v2325_v48, 16  ;;  %v445_v55 = vshrl.u32 %v2325_v48, 16  ;;  %s1832_s17 = sshll.u32 %s2260_s16, 3 }
  0x1c   : > { %v431_v38 = vsel %vm395_vm1, %v426_v35, %v430_v36  ;;  %v438_v42 = vor.u32 %v437_v40, %v433_v39  ;;  %v452_v57 = vshll.u32 %v2156_v52, 16  ;;  %v633_v62 = vrot.slane %v2325_v48, 1  ;;  %v2407_v39 = vld [vmem:[%s2266_s20 + $0x60] sm:$0xff]   ;;  %v2164_v41 = vld [vmem:[%s2266_s20 + $0x68] ss:$0 sps:$4 sm:$0x11]  }
  0x1d   : > { %v632_v51 = vsel %vm620_vm0, %v630_v46, %v631_v47  ;;  %v449_v56 = vrot.slane %v447_v53, 1  ;;  %v634_v63 = vrot.slane %v2156_v52, 1  ;;  %v459_v4 = vshll.u32 %v2344_v60, 16  ;;  %v2166_v53 = vld [vmem:[%s2266_s20 + $0x74] ss:$0 sps:$4 sm:$0x11]  }
  0x1e   : > { %590 = vrot.lane.b32.xlu0 %v419_v32, %s2213_s24  ;;  %v443_v44 = vsel %vm395_vm1, %v438_v42, %v442_v43  ;;  %v454_v59 = vrot.slane %v452_v57, 1  ;;  %v457_v6 = vshrl.u32 %v2344_v60, 16  ;;  %v464_v8 = vshll.u32 %v2158_v2, 16 }
  0x1f   : > { %790 = vrot.lane.b32.xlu1 %v629_v34, %s2211_s22  ;;  %v450_v58 = vor.u32 %v449_v56, %v445_v55  ;;  %v635_v5 = vsel %vm620_vm0, %v633_v62, %v634_v63  ;;  %v461_v7 = vrot.slane %v459_v4, 1  ;;  %v636_v12 = vrot.slane %v2344_v60, 1 }
  0x20   : > { %v466_v10 = vrot.slane %v464_v8, 1  ;;  %v637_v13 = vrot.slane %v2158_v2, 1  ;;  %v471_v17 = vshll.u32 %v2369_v14, 16  ;;  %v469_v18 = vshrl.u32 %v2369_v14, 16 }
  0x21   : > { %v455_v61 = vsel %vm395_vm1, %v450_v58, %v454_v59  ;;  %v462_v9 = vor.u32 %v461_v7, %v457_v6  ;;  %v476_v20 = vshll.u32 %v2160_v16, 16  ;;  %v639_v25 = vrot.slane %v2369_v14, 1 }
  0x22   : > { %753 = vrot.lane.b32.xlu0 %v419_v32, %s2214_s25  ;;  %v638_v15 = vsel %vm620_vm0, %v636_v12, %v637_v13  ;;  %v473_v19 = vrot.slane %v471_v17, 1  ;;  %v640_v26 = vrot.slane %v2160_v16, 1  ;;  %v483_v28 = vshll.u32 %v2382_v23, 16  ;;  %v2170_v13 = vld [vmem:[%s2266_s20 + $0x80] ss:$0 sps:$4 sm:$0x11]  }
  0x23   : > { %755 = vrot.lane.b32.xlu1 %v431_v38, %s2214_s25  ;;  %v467_v11 = vsel %vm395_vm1, %v462_v9, %v466_v10  ;;  %v478_v22 = vrot.slane %v476_v20, 1  ;;  %v481_v31 = vshrl.u32 %v2382_v23, 16  ;;  %v488_v33 = vshll.u32 %v2162_v27, 16  ;;  %v2445_v9 = vld [vmem:[%s2266_s20 + $0x78] sm:$0xff]  }
  0x24   : > { %v474_v21 = vor.u32 %v473_v19, %v469_v18  ;;  %v641_v29 = vsel %vm620_vm0, %v639_v25, %v640_v26  ;;  %v485_v32 = vrot.slane %v483_v28, 1  ;;  %v642_v37 = vrot.slane %v2382_v23, 1  ;;  %v2463_v28 = vld [vmem:[%s2266_s20 + $0x84] sm:$0xff]  }
  0x25   : > { %v490_v35 = vrot.slane %v488_v33, 1  ;;  %v495_v42 = vshll.u32 %v2407_v39, 16  ;;  %v493_v43 = vshrl.u32 %v2407_v39, 16  ;;  %v500_v45 = vshll.u32 %v2164_v41, 16 }
  0x26   : > { %825 = vrot.lane.b32.xlu0 %v2269_v0, %s2215_s26  ;;  %v479_v24 = vsel %vm395_vm1, %v474_v21, %v478_v22  ;;  %v646_v52 = vrot.slane %v2164_v41, 1  ;;  %v507_v54 = vshll.u32 %v2420_v49, 16  ;;  %v505_v56 = vshrl.u32 %v2420_v49, 16 }
  0x27   : > { %827 = vrot.lane.b32.xlu1 %v2298_v30, %s2215_s26  ;;  %v502_v47 = vrot.slane %v500_v45, 1  ;;  %v512_v58 = vshll.u32 %v2166_v53, 16  ;;  %v648_v6 = vrot.slane %v2420_v49, 1  ;;  %v649_v7 = vrot.slane %v2166_v53, 1 }
  0x28   : > { %v509_v57 = vrot.slane %v507_v54, 1  ;;  %v517_v19 = vshrl.u32 %v2445_v9, 16  ;;  %v524_v21 = vshll.u32 %v2170_v13, 16  ;;  %v651_v33 = vrot.slane %v2445_v9, 1 }
  0x29   : > { %v514_v63 = vrot.slane %v512_v58, 1  ;;  %v529_v45 = vshrl.u32 %v2463_v28, 16 }
  0x2a   : > { %872 = vrot.lane.b32.xlu0 %v431_v38, %s2216_s27  ;;  %v510_v62 = vor.u32 %v509_v57, %v505_v56 }
  0x2b   : > { %874 = vrot.lane.b32.xlu1 %v443_v44, %s2216_s27 }
  0x2c   : > { %v515_v4 = vsel %vm395_vm1, %v510_v62, %v514_v63 }
  0x2e   : > { %907 = vrot.lane.b32.xlu0 %v629_v34, %s2217_s5 }
  0x2f   : > { %592 = vrot.lane.b32.xlu1 %v431_v38, %s2213_s24  ;;  %v643_v38 = vrot.slane %v2162_v27, 1 }
  0x31   : > { %v644_v40 = vsel %vm620_vm0, %v642_v37, %v643_v38  ;;  %v652_v37 = vrot.slane %v2170_v13, 1  ;;  %v2173_v38 = vld [vmem:[%s2266_s20 + $0x8c] ss:$0 sps:$4 sm:$0x11]  }
  0x32   : > { %909 = vrot.lane.b32.xlu0 %v632_v51, %s2217_s5 }
  0x33   : > { %594 = vrot.lane.b32.xlu1 %v443_v44, %s2213_s24 }
  0x36   : > { %673 = vrot.lane.b32.xlu0 %v629_v34, %s2212_s23  ;;  %v486_v34 = vor.u32 %v485_v32, %v481_v31 }
  0x37   : > { %675 = vrot.lane.b32.xlu1 %v632_v51, %s2212_s23 }
  0x38   : > { %v491_v36 = vsel %vm395_vm1, %v486_v34, %v490_v35 }
  0x3a   : > { %710 = vrot.lane.b32.xlu0 %v2298_v30, %s2210_s21 }
  0x3b   : > { %712 = vrot.lane.b32.xlu1 %v2325_v48, %s2210_s21 }
  0x3e   : > { %757 = vrot.lane.b32.xlu0 %v443_v44, %s2214_s25  ;;  %v497_v44 = vrot.slane %v495_v42, 1 }
  0x3f   : > { %759 = vrot.lane.b32.xlu1 %v455_v61, %s2214_s25 }
  0x40   : > { %v498_v46 = vor.u32 %v497_v44, %v493_v43 }
  0x42   : > { %792 = vrot.lane.b32.xlu0 %v632_v51, %s2211_s22  ;;  %v503_v50 = vsel %vm395_vm1, %v498_v46, %v502_v47  ;;  %v645_v51 = vrot.slane %v2407_v39, 1 }
  0x43   : > { %794 = vrot.lane.b32.xlu1 %v635_v5, %s2211_s22 }
  0x44   : > { %v647_v55 = vsel %vm620_vm0, %v645_v51, %v646_v52  ;;  %v536_v52 = vshll.u32 %v2173_v38, 16 }
  0x46   : > { %829 = vrot.lane.b32.xlu0 %v2325_v48, %s2215_s26 }
  0x47   : > { %831 = vrot.lane.b32.xlu1 %v2344_v60, %s2215_s26 }
  0x4a   : > { %876 = vrot.lane.b32.xlu0 %v455_v61, %s2216_s27 }
  0x4b   : > { %878 = vrot.lane.b32.xlu1 %v467_v11, %s2216_s27 }
  0x4e   : > { %911 = vrot.lane.b32.xlu0 %v635_v5, %s2217_s5 }
  0x4f   : > { %596 = vrot.lane.b32.xlu1 %v455_v61, %s2213_s24 }
  0x52   : > { %913 = vrot.lane.b32.xlu0 %v638_v15, %s2217_s5 }
  0x53   : > { %598 = vrot.lane.b32.xlu1 %v467_v11, %s2213_s24 }
  0x56   : > { %677 = vrot.lane.b32.xlu0 %v635_v5, %s2212_s23 }
  0x57   : > { %679 = vrot.lane.b32.xlu1 %v638_v15, %s2212_s23 }
  0x5a   : > { %714 = vrot.lane.b32.xlu0 %v2344_v60, %s2210_s21 }
  0x5b   : > { %716 = vrot.lane.b32.xlu1 %v2369_v14, %s2210_s21 }
  0x5e   : > { %761 = vrot.lane.b32.xlu0 %v467_v11, %s2214_s25  ;;  %v650_v11 = vsel %vm620_vm0, %v648_v6, %v649_v7  ;;  %v654_v6 = vrot.slane %v2463_v28, 1  ;;  %v655_v7 = vrot.slane %v2173_v38, 1 }
  0x5f   : > { %763 = vrot.lane.b32.xlu1 %v479_v24, %s2214_s25 }
  0x62   : > { %796 = vrot.lane.b32.xlu0 %v638_v15, %s2211_s22  ;;  %v519_v15 = vshll.u32 %v2445_v9, 16 }
  0x63   : > { %798 = vrot.lane.b32.xlu1 %v641_v29, %s2211_s22 }
  0x64   : > { %v521_v20 = vrot.slane %v519_v15, 1  ;;  %v2175_v15 = vld [vmem:[%s2266_s20 + $0x98] ss:$0 sps:$4 sm:$0x11]  }
  0x66   : > { %833 = vrot.lane.b32.xlu0 %v2369_v14, %s2215_s26  ;;  %v522_v27 = vor.u32 %v521_v20, %v517_v19 }
  0x67   : > { %835 = vrot.lane.b32.xlu1 %v2382_v23, %s2215_s26 }
  0x6a   : > { %880 = vrot.lane.b32.xlu0 %v479_v24, %s2216_s27 }
  0x6b   : > { %882 = vrot.lane.b32.xlu1 %v491_v36, %s2216_s27 }
  0x6e   : > { %915 = vrot.lane.b32.xlu0 %v641_v29, %s2217_s5 }
  0x6f   : > { %600 = vrot.lane.b32.xlu1 %v479_v24, %s2213_s24 }
  0x72   : > { %917 = vrot.lane.b32.xlu0 %v644_v40, %s2217_s5 }
  0x73   : > { %602 = vrot.lane.b32.xlu1 %v491_v36, %s2213_s24 }
  0x76   : > { %681 = vrot.lane.b32.xlu0 %v641_v29, %s2212_s23 }
  0x77   : > { %683 = vrot.lane.b32.xlu1 %v644_v40, %s2212_s23 }
  0x7a   : > { %718 = vrot.lane.b32.xlu0 %v2382_v23, %s2210_s21 }
  0x7b   : > { %720 = vrot.lane.b32.xlu1 %v2407_v39, %s2210_s21 }
  0x7e   : > { %765 = vrot.lane.b32.xlu0 %v491_v36, %s2214_s25 }
  0x7f   : > { %767 = vrot.lane.b32.xlu1 %v503_v50, %s2214_s25 }
  0x82   : > { %800 = vrot.lane.b32.xlu0 %v644_v40, %s2211_s22  ;;  %v531_v40 = vshll.u32 %v2463_v28, 16 }
  0x83   : > { %802 = vrot.lane.b32.xlu1 %v647_v55, %s2211_s22 }
  0x84   : > { %v709_v59 = vpop.permute.xlu1 %708  ;;  %v707_v61 = vpop.permute.xlu0 %706  ;;  %v533_v51 = vrot.slane %v531_v40, 1 }
  0x86   : > { %837 = vrot.lane.b32.xlu0 %v2407_v39, %s2215_s26 }
  0x87   : > { %839 = vrot.lane.b32.xlu1 %v2420_v49, %s2215_s26 }
  0x88   : > { %v789_v2 = vpop.permute.xlu0 %788 }
  0x89   : > { %v670_v5 = vpop.permute.xlu1 %669 }
  0x8a   : > { %884 = vrot.lane.b32.xlu0 %v503_v50, %s2216_s27 }
  0x8b   : > { %886 = vrot.lane.b32.xlu1 %v515_v4, %s2216_s27 }
  0x8c   : > { %v589_v8 = vpop.permute.xlu0 %588 }
  0x8d   : > { %v672_v10 = vpop.permute.xlu1 %671  ;;  %v941_v17 = vsel %vm939_vm3, %v2278_v3, %v589_v8  ;;  %v526_v3 = vrot.slane %v524_v21, 1  ;;  %v548_v21 = vshll.u32 %v2175_v15, 16 }
  0x8e   : > { %919 = vrot.lane.b32.xlu0 %v647_v55, %s2217_s5  ;;  %v974_v25 = vsel %vm972_vm4, %v941_v17, %v670_v5 }
  0x8f   : > { %604 = vrot.lane.b32.xlu1 %v503_v50, %s2213_s24  ;;  %v1007_v32 = vsel %vm1005_vm5, %v974_v25, %v707_v61  ;;  %v527_v36 = vsel %vm395_vm1, %v522_v27, %v526_v3  ;;  %v653_v50 = vsel %vm620_vm0, %v651_v33, %v652_v37  ;;  %v538_v61 = vrot.slane %v536_v52, 1  ;;  %v2516_v27 = vld [vmem:[%s2266_s20 + $0x9c] sm:$0xff]  }
  0x90   : > { %v591_v12 = vpop.permute.xlu0 %590  ;;  %v555_v37 = vshll.u32 %v2516_v27, 16 }
  0x91   : > { %v791_v16 = vpop.permute.xlu1 %790  ;;  %v943_v24 = vsel %vm939_vm3, %v2272_v1, %v591_v12  ;;  %v656_v12 = vsel %vm620_vm0, %v654_v6, %v655_v7  ;;  %v660_v6 = vrot.slane %v2516_v27, 1 }
  0x92   : > { %921 = vrot.lane.b32.xlu0 %v650_v11, %s2217_s5  ;;  %v976_v29 = vsel %vm972_vm4, %v943_v24, %v672_v10  ;;  %v2503_v10 = vld [vmem:[%s2266_s20 + $0x90] sm:$0xff]  }
  0x93   : > { %606 = vrot.lane.b32.xlu1 %v515_v4, %s2213_s24  ;;  %v1009_v34 = vsel %vm1005_vm5, %v976_v29, %v709_v59  ;;  %v534_v59 = vor.u32 %v533_v51, %v529_v45  ;;  %v541_v19 = vshrl.u32 %v2503_v10, 16  ;;  %v553_v45 = vshrl.u32 %v2516_v27, 16 }
  0x94   : > { %v754_v18 = vpop.permute.xlu0 %753 }
  0x95   : > { %v756_v22 = vpop.permute.xlu1 %755  ;;  %v1040_v1 = vsel %vm1038_vm6, %v1007_v32, %v754_v18  ;;  %v657_v32 = vrot.slane %v2503_v10, 1 }
  0x96   : > { %685 = vrot.lane.b32.xlu0 %v647_v55, %s2212_s23  ;;  %v1073_v42 = vsel %vm1071_vm7, %v1040_v1, %v789_v2  ;;  %v1042_v43 = vsel %vm1038_vm6, %v1009_v34, %v756_v22  ;;  %v658_v1 = vrot.slane %v2175_v15, 1 }
  0x97   : > { %687 = vrot.lane.b32.xlu1 %v650_v11, %s2212_s23  ;;  %v1075_v55 = vsel %vm1071_vm7, %v1042_v43, %v791_v16  ;;  %v543_v16 = vshll.u32 %v2503_v10, 16 }
  0x98   : > { %v826_v26 = vpop.permute.xlu0 %825 }
  0x99   : > { %v828_v31 = vpop.permute.xlu1 %827  ;;  %v1106_v44 = vsel %vm1104_vm8, %v1073_v42, %v826_v26  ;;  %v545_v20 = vrot.slane %v543_v16, 1  ;;  %v550_v26 = vrot.slane %v548_v21, 1  ;;  %v2179_v16 = vld [vmem:[%s2266_s20 + $0xb0] ss:$0 sps:$4 sm:$0x11]  }
  0x9a   : > { %722 = vrot.lane.b32.xlu0 %v2420_v49, %s2210_s21  ;;  %v1108_v56 = vsel %vm1104_vm8, %v1075_v55, %v828_v31 }
  0x9b   : > { %724 = vrot.lane.b32.xlu1 %v2445_v9, %s2210_s21  ;;  %v546_v25 = vor.u32 %v545_v20, %v541_v19 }
  0x9c   : > { %v873_v35 = vpop.permute.xlu0 %872 }
  0x9d   : > { %v875_v41 = vpop.permute.xlu1 %874  ;;  %v1139_v46 = vsel %vm1137_vm9, %v1106_v44, %v873_v35  ;;  %v551_v35 = vsel %vm395_vm1, %v546_v25, %v550_v26  ;;  %v659_v44 = vsel %vm620_vm0, %v657_v32, %v658_v1 }
  0x9e   : > { %769 = vrot.lane.b32.xlu0 %v515_v4, %s2214_s25  ;;  %v1141_v57 = vsel %vm1137_vm9, %v1108_v56, %v875_v41  ;;  %v539_v4 = vsel %vm395_vm1, %v534_v59, %v538_v61 }
  0x9f   : > { %771 = vrot.lane.b32.xlu1 %v527_v36, %s2214_s25 }
  0xa0   : > { %v908_v47 = vpop.permute.xlu0 %907 }
  0xa1   : > { %v593_v53 = vpop.permute.xlu1 %592  ;;  %v1172_v54 = vsel %vm1170_vm10, %v1139_v46, %v908_v47 }
  0xa2   : > { %804 = vrot.lane.b32.xlu0 %v650_v11, %s2211_s22  ;;  %2074 = vmatprep.mubr.msk.bf16.mxu0 %vm1223_vm11, %v1172_v54  ;;  %v945_v29 = vsel %vm939_vm3, %v2269_v0, %v593_v53 }
  0xa3   : > { %806 = vrot.lane.b32.xlu1 %v653_v50, %s2211_s22 }
  0xa4   : > { %v910_v58 = vpop.permute.xlu0 %909 }
  0xa5   : > { %v595_v62 = vpop.permute.xlu1 %594  ;;  %v1174_v63 = vsel %vm1170_vm10, %v1141_v57, %v910_v58 }
  0xa6   : > { %841 = vrot.lane.b32.xlu0 %v2445_v9, %s2215_s26  ;;  %2075 = vmatmul.mubr.msk.bf16.vlgmr.msra.gmra.mxu0 %vm1223_vm11, %v1174_v63  ;;  %v947_v40 = vsel %vm939_vm3, %v2298_v30, %v595_v62  ;;  %v557_v30 = vrot.slane %v555_v37, 1 }
  0xa7   : > { %843 = vrot.lane.b32.xlu1 %v2463_v28, %s2215_s26 }
  0xa8   : > { %v674_v2 = vpop.permute.xlu0 %673  ;;  %v558_v59 = vor.u32 %v557_v30, %v553_v45 }
  0xa9   : > { %v676_v5 = vpop.permute.xlu1 %675  ;;  %v978_v31 = vsel %vm972_vm4, %v945_v29, %v674_v2  ;;  %v2574_v29 = vld [vmem:[%s2266_s20 + $0xb4] sm:$0xff]  }
  0xaa   : > { %888 = vrot.lane.b32.xlu0 %v527_v36, %s2216_s27  ;;  %v980_v42 = vsel %vm972_vm4, %v947_v40, %v676_v5 }
  0xab   : > { %890 = vrot.lane.b32.xlu1 %v539_v4, %s2216_s27 }
  0xac   : > { %v711_v8 = vpop.permute.xlu0 %710 }
  0xad   : > { %v713_v11 = vpop.permute.xlu1 %712  ;;  %v1011_v33 = vsel %vm1005_vm5, %v978_v31, %v711_v8 }
  0xae   : > { %923 = vrot.lane.b32.xlu0 %v653_v50, %s2217_s5  ;;  %v1013_v46 = vsel %vm1005_vm5, %v980_v42, %v713_v11  ;;  %v2561_v11 = vld [vmem:[%s2266_s20 + $0xa8] sm:$0xff]  }
  0xaf   : > { %608 = vrot.lane.b32.xlu1 %v527_v36, %s2213_s24  ;;  %v2177_v36 = vld [vmem:[%s2266_s20 + $0xa4] ss:$0 sps:$4 sm:$0x11]   ;;  %v565_v20 = vshrl.u32 %v2561_v11, 16 }
  0xb0   : > { %v758_v13 = vpop.permute.xlu0 %757  ;;  %v560_v51 = vshll.u32 %v2177_v36, 16  ;;  %v661_v7 = vrot.slane %v2177_v36, 1 }
  0xb1   : > { %v760_v17 = vpop.permute.xlu1 %759  ;;  %v1044_v0 = vsel %vm1038_vm6, %v1011_v33, %v758_v13  ;;  %v663_v33 = vrot.slane %v2561_v11, 1 }
  0xb2   : > { %925 = vrot.lane.b32.xlu0 %v656_v12, %s2217_s5  ;;  %v1046_v52 = vsel %vm1038_vm6, %v1013_v46, %v760_v17  ;;  %v562_v61 = vrot.slane %v560_v51, 1  ;;  %v662_v13 = vsel %vm620_vm0, %v660_v6, %v661_v7  ;;  %v567_v17 = vshll.u32 %v2561_v11, 16 }
  0xb3   : > { %610 = vrot.lane.b32.xlu1 %v539_v4, %s2213_s24  ;;  %v577_v46 = vshrl.u32 %v2574_v29, 16  ;;  %v666_v6 = vrot.slane %v2574_v29, 1 }
  0xb4   : > { %v793_v18 = vpop.permute.xlu0 %792  ;;  %v569_v21 = vrot.slane %v567_v17, 1  ;;  %v2183_v17 = vld [vmem:[%s2266_s20 + $0xc8] ss:$0 sps:$4 sm:$0x11]  }
  0xb5   : > { %v795_v22 = vpop.permute.xlu1 %794  ;;  %v1077_v41 = vsel %vm1071_vm7, %v1044_v0, %v793_v18  ;;  %v2181_v0 = vld [vmem:[%s2266_s20 + $0xbc] ss:$0 sps:$4 sm:$0x11]  }
  0xb6   : > { %689 = vrot.lane.b32.xlu0 %v653_v50, %s2212_s23  ;;  %v1079_v55 = vsel %vm1071_vm7, %v1046_v52, %v795_v22  ;;  %v572_v22 = vshll.u32 %v2179_v16, 16  ;;  %v570_v26 = vor.u32 %v569_v21, %v565_v20  ;;  %v584_v51 = vshll.u32 %v2181_v0, 16 }
  0xb7   : > { %691 = vrot.lane.b32.xlu1 %v656_v12, %s2212_s23  ;;  %v667_v7 = vrot.slane %v2181_v0, 1 }
  0xb8   : > { %v830_v24 = vpop.permute.xlu0 %829 }
  0xb9   : > { %v832_v3 = vpop.permute.xlu1 %831  ;;  %v1110_v43 = vsel %vm1104_vm8, %v1077_v41, %v830_v24 }
  0xba   : > { %726 = vrot.lane.b32.xlu0 %v2463_v28, %s2210_s21  ;;  %v1112_v56 = vsel %vm1104_vm8, %v1079_v55, %v832_v3  ;;  %v574_v3 = vrot.slane %v572_v22, 1 }
  0xbb   : > { %728 = vrot.lane.b32.xlu1 %v2503_v10, %s2210_s21 }
  0xbc   : > { %v877_v34 = vpop.permute.xlu0 %876  ;;  %v575_v37 = vsel %vm395_vm1, %v570_v26, %v574_v3 }
  0xbd   : > { %v879_v38 = vpop.permute.xlu1 %878  ;;  %v1143_v47 = vsel %vm1137_vm9, %v1110_v43, %v877_v34  ;;  %v664_v34 = vrot.slane %v2179_v16, 1 }
  0xbe   : > { %773 = vrot.lane.b32.xlu0 %v539_v4, %s2214_s25  ;;  %v1145_v57 = vsel %vm1137_vm9, %v1112_v56, %v879_v38  ;;  %v563_v4 = vsel %vm395_vm1, %v558_v59, %v562_v61  ;;  %v579_v38 = vshll.u32 %v2574_v29, 16  ;;  %v586_v61 = vrot.slane %v584_v51, 1 }
  0xbf   : > { %775 = vrot.lane.b32.xlu1 %v551_v35, %s2214_s25  ;;  %v665_v45 = vsel %vm620_vm0, %v663_v33, %v664_v34 }
  0xc0   : > { %v912_v50 = vpop.permute.xlu0 %911 }
  0xc1   : > { %v597_v53 = vpop.permute.xlu1 %596  ;;  %v1176_v54 = vsel %vm1170_vm10, %v1143_v47, %v912_v50 }
  0xc2   : > { %808 = vrot.lane.b32.xlu0 %v656_v12, %s2211_s22  ;;  %2078 = vmatprep.mubr.msk.bf16.mxu0 %vm1223_vm11, %v1176_v54  ;;  %v949_v32 = vsel %vm939_vm3, %v2325_v48, %v597_v53 }
  0xc3   : > { %810 = vrot.lane.b32.xlu1 %v659_v44, %s2211_s22 }
  0xc4   : > { %v914_v58 = vpop.permute.xlu0 %913 }
  0xc5   : > { %v599_v62 = vpop.permute.xlu1 %598  ;;  %v1178_v63 = vsel %vm1170_vm10, %v1145_v57, %v914_v58 }
  0xc6   : > { %845 = vrot.lane.b32.xlu0 %v2503_v10, %s2215_s26  ;;  %2079 = vmatmul.mubr.msk.bf16.gmra.mxu0 %vm1223_vm11, %v1178_v63  ;;  %v951_v41 = vsel %vm939_vm3, %v2344_v60, %v599_v62  ;;  %v581_v60 = vrot.slane %v579_v38, 1 }
  0xc7   : > { %847 = vrot.lane.b32.xlu1 %v2516_v27, %s2215_s26 }
  0xc8   : > { %v678_v2 = vpop.permute.xlu0 %677  ;;  %v582_v59 = vor.u32 %v581_v60, %v577_v46 }
  0xc9   : > { %v680_v5 = vpop.permute.xlu1 %679  ;;  %v982_v1 = vsel %vm972_vm4, %v949_v32, %v678_v2  ;;  %v2184_v32 = vld [vmem:[%s2266_s20 + $0xcc] sm:$0xff]  }
  0xca   : > { %892 = vrot.lane.b32.xlu0 %v551_v35, %s2216_s27  ;;  %v984_v43 = vsel %vm972_vm4, %v951_v41, %v680_v5 }
  0xcb   : > { %894 = vrot.lane.b32.xlu1 %v563_v4, %s2216_s27 }
  0xcc   : > { %v715_v8 = vpop.permute.xlu0 %714 }
  0xcd   : > { %v717_v12 = vpop.permute.xlu1 %716 }
  0xce   : > { %927 = vrot.lane.b32.xlu0 %v659_v44, %s2217_s5  ;;  %v1017_v47 = vsel %vm1005_vm5, %v984_v43, %v717_v12  ;;  %v2619_v12 = vld [vmem:[%s2266_s20 + $0xc0] sm:$0xff]  }
  0xcf   : > { %612 = vrot.lane.b32.xlu1 %v551_v35, %s2213_s24  ;;  %v1015_v35 = vsel %vm1005_vm5, %v982_v1, %v715_v8  ;;  %v742_v21 = vshrl.u32 %v2619_v12, 16 }
  0xd0   : > { %v762_v15 = vpop.permute.xlu0 %761 }
  0xd1   : > { %v764_v18 = vpop.permute.xlu1 %763  ;;  %v1048_v48 = vsel %vm1038_vm6, %v1015_v35, %v762_v15  ;;  %v668_v15 = vsel %vm620_vm0, %v666_v6, %v667_v7  ;;  %v785_v35 = vrot.slane %v2619_v12, 1 }
  0xd2   : > { %929 = vrot.lane.b32.xlu0 %v662_v13, %s2217_s5  ;;  %v1050_v52 = vsel %vm1038_vm6, %v1017_v47, %v764_v18  ;;  %v744_v18 = vshll.u32 %v2619_v12, 16  ;;  %v861_v47 = vshrl.u32 %v2184_v32, 16 }
  0xd3   : > { %614 = vrot.lane.b32.xlu1 %v563_v4, %s2213_s24 }
  0xd4   : > { %v797_v19 = vpop.permute.xlu0 %796  ;;  %v746_v22 = vrot.slane %v744_v18, 1 }
  0xd5   : > { %v799_v24 = vpop.permute.xlu1 %798  ;;  %v1081_v42 = vsel %vm1071_vm7, %v1048_v48, %v797_v19  ;;  %v2185_v48 = vld [vmem:[%s2266_s20 + $0xd4] ss:$0 sps:$4 sm:$0x11]   ;;  %s2907_s20 = scalar_lea.vmem %s2989_s3, %s1832_s17 }
  0xd6   : > { %693 = vrot.lane.b32.xlu0 %v659_v44, %s2212_s23  ;;  %v1083_v55 = vsel %vm1071_vm7, %v1050_v52, %v799_v24  ;;  %v749_v24 = vshll.u32 %v2183_v17, 16  ;;  %v747_v3 = vor.u32 %v746_v22, %v742_v21  ;;  %v905_v6 = vrot.slane %v2185_v48, 1 }
  0xd7   : > { %695 = vrot.lane.b32.xlu1 %v662_v13, %s2212_s23 }
  0xd8   : > { %v834_v25 = vpop.permute.xlu0 %833 }
  0xd9   : > { %v836_v31 = vpop.permute.xlu1 %835  ;;  %v1114_v44 = vsel %vm1104_vm8, %v1081_v42, %v834_v25 }
  0xda   : > { %730 = vrot.lane.b32.xlu0 %v2516_v27, %s2210_s21  ;;  %v1116_v56 = vsel %vm1104_vm8, %v1083_v55, %v836_v31  ;;  %v751_v31 = vrot.slane %v749_v24, 1 }
  0xdb   : > { %732 = vrot.lane.b32.xlu1 %v2561_v11, %s2210_s21 }
  0xdc   : > { %v881_v36 = vpop.permute.xlu0 %880  ;;  %v752_v38 = vsel %vm395_vm1, %v747_v3, %v751_v31 }
  0xdd   : > { %v883_v40 = vpop.permute.xlu1 %882  ;;  %v1147_v50 = vsel %vm1137_vm9, %v1114_v44, %v881_v36  ;;  %v786_v36 = vrot.slane %v2183_v17, 1 }
  0xde   : > { %777 = vrot.lane.b32.xlu0 %v563_v4, %s2214_s25  ;;  %v1149_v57 = vsel %vm1137_vm9, %v1116_v56, %v883_v40  ;;  %v587_v4 = vsel %vm395_vm1, %v582_v59, %v586_v61  ;;  %v863_v40 = vshll.u32 %v2184_v32, 16 }
  0xdf   : > { %779 = vrot.lane.b32.xlu1 %v575_v37, %s2214_s25  ;;  %v787_v46 = vsel %vm620_vm0, %v785_v35, %v786_v36 }
  0xe0   : > { %v916_v30 = vpop.permute.xlu0 %915  ;;  %v865_v51 = vrot.slane %v863_v40, 1 }
  0xe1   : > { %v601_v53 = vpop.permute.xlu1 %600  ;;  %v1180_v54 = vsel %vm1170_vm10, %v1147_v50, %v916_v30 }
  0xe2   : > { %812 = vrot.lane.b32.xlu0 %v662_v13, %s2211_s22  ;;  %2082 = vmatprep.mubr.msk.bf16.mxu0 %vm1223_vm11, %v1180_v54  ;;  %v953_v33 = vsel %vm939_vm3, %v2369_v14, %v601_v53  ;;  %v866_v59 = vor.u32 %v865_v51, %v861_v47 }
  0xe3   : > { %814 = vrot.lane.b32.xlu1 %v665_v45, %s2211_s22 }
  0xe4   : > { %v918_v58 = vpop.permute.xlu0 %917 }
  0xe5   : > { %v603_v62 = vpop.permute.xlu1 %602  ;;  %v1182_v63 = vsel %vm1170_vm10, %v1149_v57, %v918_v58 }
  0xe6   : > { %849 = vrot.lane.b32.xlu0 %v2561_v11, %s2215_s26  ;;  %2083 = vmatmul.mubr.msk.bf16.gmra.mxu0 %vm1223_vm11, %v1182_v63  ;;  %v955_v42 = vsel %vm939_vm3, %v2382_v23, %v603_v62  ;;  %v868_v23 = vshll.u32 %v2185_v48, 16 }
  0xe7   : > { %851 = vrot.lane.b32.xlu1 %v2574_v29, %s2215_s26 }
  0xe8   : > { %v682_v2 = vpop.permute.xlu0 %681  ;;  %v870_v61 = vrot.slane %v868_v23, 1 }
  0xe9   : > { %v684_v5 = vpop.permute.xlu1 %683  ;;  %v986_v34 = vsel %vm972_vm4, %v953_v33, %v682_v2 }
  0xea   : > { %896 = vrot.lane.b32.xlu0 %v575_v37, %s2216_s27  ;;  %v988_v44 = vsel %vm972_vm4, %v955_v42, %v684_v5  ;;  %v904_v5 = vrot.slane %v2184_v32, 1 }
  0xeb   : > { %898 = vrot.lane.b32.xlu1 %v587_v4, %s2216_s27 }
  0xec   : > { %v719_v8 = vpop.permute.xlu0 %718 }
  0xed   : > { %v721_v13 = vpop.permute.xlu1 %720 }
  0xee   : > { %931 = vrot.lane.b32.xlu0 %v665_v45, %s2217_s5  ;;  %v1021_v50 = vsel %vm1005_vm5, %v988_v44, %v721_v13  ;;  %v906_v13 = vsel %vm620_vm0, %v904_v5, %v905_v6 }
  0xef   : > { %616 = vrot.lane.b32.xlu1 %v575_v37, %s2213_s24  ;;  %v1019_v37 = vsel %vm1005_vm5, %v986_v34, %v719_v8 }
  0xf0   : > { %v766_v16 = vpop.permute.xlu0 %765 }
  0xf1   : > { %v768_v19 = vpop.permute.xlu1 %767  ;;  %v1052_v14 = vsel %vm1038_vm6, %v1019_v37, %v766_v16 }
  0xf2   : > { %933 = vrot.lane.b32.xlu0 %v668_v15, %s2217_s5  ;;  %v1054_v52 = vsel %vm1038_vm6, %v1021_v50, %v768_v19 }
  0xf3   : > { %618 = vrot.lane.b32.xlu1 %v587_v4, %s2213_s24 }
  0xf4   : > { %v801_v20 = vpop.permute.xlu0 %800 }
  0xf5   : > { %v803_v25 = vpop.permute.xlu1 %802  ;;  %v1085_v43 = vsel %vm1071_vm7, %v1052_v14, %v801_v20 }
  0xf6   : > { %697 = vrot.lane.b32.xlu0 %v665_v45, %s2212_s23  ;;  %v1087_v55 = vsel %vm1071_vm7, %v1054_v52, %v803_v25 }
  0xf7   : > { %699 = vrot.lane.b32.xlu1 %v668_v15, %s2212_s23 }
  0xf8   : > { %v838_v26 = vpop.permute.xlu0 %837 }
  0xf9   : > { %v840_v1 = vpop.permute.xlu1 %839  ;;  %v1118_v45 = vsel %vm1104_vm8, %v1085_v43, %v838_v26 }
  0xfa   : > { %734 = vrot.lane.b32.xlu0 %v2574_v29, %s2210_s21  ;;  %v1120_v56 = vsel %vm1104_vm8, %v1087_v55, %v840_v1 }
  0xfb   : > { %736 = vrot.lane.b32.xlu1 %v2619_v12, %s2210_s21 }
  0xfc   : > { %v885_v0 = vpop.permute.xlu0 %884 }
  0xfd   : > { %v887_v41 = vpop.permute.xlu1 %886  ;;  %v1151_v30 = vsel %vm1137_vm9, %v1118_v45, %v885_v0 }
  0xfe   : > { %781 = vrot.lane.b32.xlu0 %v587_v4, %s2214_s25  ;;  %v1153_v57 = vsel %vm1137_vm9, %v1120_v56, %v887_v41  ;;  %v871_v4 = vsel %vm395_vm1, %v866_v59, %v870_v61 }
  0xff   : > { %783 = vrot.lane.b32.xlu1 %v752_v38, %s2214_s25 }
 0x100   : > { %v920_v60 = vpop.permute.xlu0 %919 }
 0x101   : > { %v605_v53 = vpop.permute.xlu1 %604  ;;  %v1184_v54 = vsel %vm1170_vm10, %v1151_v30, %v920_v60 }
 0x102   : > { %816 = vrot.lane.b32.xlu0 %v668_v15, %s2211_s22  ;;  %2086 = vmatprep.mubr.msk.bf16.mxu0 %vm1223_vm11, %v1184_v54  ;;  %v957_v21 = vsel %vm939_vm3, %v2407_v39, %v605_v53 }
 0x103   : > { %818 = vrot.lane.b32.xlu1 %v787_v46, %s2211_s22 }
 0x104   : > { %v922_v58 = vpop.permute.xlu0 %921 }
 0x105   : > { %v607_v62 = vpop.permute.xlu1 %606  ;;  %v1186_v63 = vsel %vm1170_vm10, %v1153_v57, %v922_v58 }
 0x106   : > { %853 = vrot.lane.b32.xlu0 %v2619_v12, %s2215_s26  ;;  %2087 = vmatmul.mubr.msk.bf16.gmra.mxu0 %vm1223_vm11, %v1186_v63  ;;  %v959_v31 = vsel %vm939_vm3, %v2420_v49, %v607_v62 }
 0x107   : > { %855 = vrot.lane.b32.xlu1 %v2184_v32, %s2215_s26 }
 0x108   : > { %v686_v2 = vpop.permute.xlu0 %685 }
 0x109   : > { %v688_v7 = vpop.permute.xlu1 %687  ;;  %v990_v22 = vsel %vm972_vm4, %v957_v21, %v686_v2 }
 0x10a   : > { %900 = vrot.lane.b32.xlu0 %v752_v38, %s2216_s27  ;;  %v992_v1 = vsel %vm972_vm4, %v959_v31, %v688_v7 }
 0x10b   : > { %902 = vrot.lane.b32.xlu1 %v871_v4, %s2216_s27 }
 0x10c   : > { %v723_v8 = vpop.permute.xlu0 %722 }
 0x10d   : > { %v725_v15 = vpop.permute.xlu1 %724  ;;  %v1023_v24 = vsel %vm1005_vm5, %v990_v22, %v723_v8 }
 0x10e   : > { %935 = vrot.lane.b32.xlu0 %v787_v46, %s2217_s5  ;;  %v1025_v34 = vsel %vm1005_vm5, %v992_v1, %v725_v15 }
 0x10f   : > { %937 = vrot.lane.b32.xlu1 %v906_v13, %s2217_s5 }
 0x110   : > { %v770_v12 = vpop.permute.xlu0 %769 }
 0x111   : > { %v772_v16 = vpop.permute.xlu1 %771  ;;  %v1056_v26 = vsel %vm1038_vm6, %v1023_v24, %v770_v12 }
 0x112   : > { %v1058_v36 = vsel %vm1038_vm6, %v1025_v34, %v772_v16 }
 0x114   : > { %v805_v17 = vpop.permute.xlu0 %804 }
 0x115   : > { %v807_v18 = vpop.permute.xlu1 %806  ;;  %v1089_v32 = vsel %vm1071_vm7, %v1056_v26, %v805_v17 }
 0x116   : > { %v1091_v38 = vsel %vm1071_vm7, %v1058_v36, %v807_v18 }
 0x118   : > { %v842_v19 = vpop.permute.xlu0 %841 }
 0x119   : > { %v844_v20 = vpop.permute.xlu1 %843  ;;  %v1122_v33 = vsel %vm1104_vm8, %v1089_v32, %v842_v19 }
 0x11a   : > { %v1124_v49 = vsel %vm1104_vm8, %v1091_v38, %v844_v20 }
 0x11c   : > { %v889_v25 = vpop.permute.xlu0 %888 }
 0x11d   : > { %v891_v3 = vpop.permute.xlu1 %890  ;;  %v1155_v39 = vsel %vm1137_vm9, %v1122_v33, %v889_v25 }
 0x11e   : > { %v1157_v48 = vsel %vm1137_vm9, %v1124_v49, %v891_v3 }
 0x120   : > { %v924_v35 = vpop.permute.xlu0 %923 }
 0x121   : > { %v609_v37 = vpop.permute.xlu1 %608  ;;  %v1188_v0 = vsel %vm1170_vm10, %v1155_v39, %v924_v35 }
 0x122   : > { %2090 = vmatprep.mubr.msk.bf16.mxu1 %vm1223_vm11, %v1188_v0  ;;  %v961_v23 = vsel %vm939_vm3, %v2445_v9, %v609_v37 }
 0x124   : > { %v926_v40 = vpop.permute.xlu0 %925 }
 0x125   : > { %v611_v14 = vpop.permute.xlu1 %610  ;;  %v1190_v41 = vsel %vm1170_vm10, %v1157_v48, %v926_v40 }
 0x126   : > { %2091 = vmatmul.mubr.msk.bf16.vlgmr.msra.gmra.mxu1 %vm1223_vm11, %v1190_v41  ;;  %v963_v57 = vsel %vm939_vm3, %v2463_v28, %v611_v14 }
 0x128   : > { %v690_v42 = vpop.permute.xlu0 %689 }
 0x129   : > { %v692_v43 = vpop.permute.xlu1 %691  ;;  %v994_v52 = vsel %vm972_vm4, %v961_v23, %v690_v42 }
 0x12a   : > { %v996_v59 = vsel %vm972_vm4, %v963_v57, %v692_v43 }
 0x12c   : > { %v727_v44 = vpop.permute.xlu0 %726 }
 0x12d   : > { %v729_v45 = vpop.permute.xlu1 %728  ;;  %v1027_v53 = vsel %vm1005_vm5, %v994_v52, %v727_v44 }
 0x12e   : > { %v1029_v62 = vsel %vm1005_vm5, %v996_v59, %v729_v45 }
 0x130   : > { %v774_v46 = vpop.permute.xlu0 %773 }
 0x131   : > { %v776_v47 = vpop.permute.xlu1 %775  ;;  %v1060_v55 = vsel %vm1038_vm6, %v1027_v53, %v774_v46 }
 0x132   : > { %v1062_v2 = vsel %vm1038_vm6, %v1029_v62, %v776_v47 }
 0x134   : > { %v809_v50 = vpop.permute.xlu0 %808 }
 0x135   : > { %v811_v30 = vpop.permute.xlu1 %810  ;;  %v1093_v58 = vsel %vm1071_vm7, %v1060_v55, %v809_v50 }
 0x136   : > { %v1095_v6 = vsel %vm1071_vm7, %v1062_v2, %v811_v30 }
 0x138   : > { %v846_v60 = vpop.permute.xlu0 %845 }
 0x139   : > { %v848_v51 = vpop.permute.xlu1 %847  ;;  %v1126_v61 = vsel %vm1104_vm8, %v1093_v58, %v846_v60 }
 0x13a   : > { %v1128_v28 = vsel %vm1104_vm8, %v1095_v6, %v848_v51 }
 0x13c   : > { %v893_v54 = vpop.permute.xlu0 %892 }
 0x13d   : > { %v895_v56 = vpop.permute.xlu1 %894  ;;  %v1159_v9 = vsel %vm1137_vm9, %v1126_v61, %v893_v54 }
 0x13e   : > { %v1161_v7 = vsel %vm1137_vm9, %v1128_v28, %v895_v56 }
 0x140   : > { %v928_v63 = vpop.permute.xlu0 %927 }
 0x141   : > { %v613_v4 = vpop.permute.xlu1 %612  ;;  %v1192_v5 = vsel %vm1170_vm10, %v1159_v9, %v928_v63 }
 0x142   : > { %2094 = vmatprep.mubr.msk.bf16.mxu1 %vm1223_vm11, %v1192_v5  ;;  %v965_v26 = vsel %vm939_vm3, %v2503_v10, %v613_v4 }
 0x144   : > { %v930_v8 = vpop.permute.xlu0 %929 }
 0x145   : > { %v615_v13 = vpop.permute.xlu1 %614  ;;  %v1194_v15 = vsel %vm1170_vm10, %v1161_v7, %v930_v8 }
 0x146   : > { %2095 = vmatmul.mubr.msk.bf16.gmra.mxu1 %vm1223_vm11, %v1194_v15  ;;  %v967_v34 = vsel %vm939_vm3, %v2516_v27, %v615_v13 }
 0x148   : > { %v694_v12 = vpop.permute.xlu0 %693 }
 0x149   : > { %v696_v16 = vpop.permute.xlu1 %695  ;;  %v998_v3 = vsel %vm972_vm4, %v965_v26, %v694_v12 }
 0x14a   : > { %v1000_v35 = vsel %vm972_vm4, %v967_v34, %v696_v16 }
 0x14c   : > { %v731_v17 = vpop.permute.xlu0 %730 }
 0x14d   : > { %v733_v18 = vpop.permute.xlu1 %732  ;;  %v1031_v31 = vsel %vm1005_vm5, %v998_v3, %v731_v17 }
 0x14e   : > { %v1033_v10 = vsel %vm1005_vm5, %v1000_v35, %v733_v18 }
 0x150   : > { %v778_v19 = vpop.permute.xlu0 %777 }
 0x151   : > { %v780_v20 = vpop.permute.xlu1 %779  ;;  %v1064_v1 = vsel %vm1038_vm6, %v1031_v31, %v778_v19 }
 0x152   : > { %v1066_v38 = vsel %vm1038_vm6, %v1033_v10, %v780_v20 }
 0x154   : > { %v813_v21 = vpop.permute.xlu0 %812 }
 0x155   : > { %v815_v22 = vpop.permute.xlu1 %814  ;;  %v1097_v39 = vsel %vm1071_vm7, %v1064_v1, %v813_v21 }
 0x156   : > { %v1099_v40 = vsel %vm1071_vm7, %v1066_v38, %v815_v22 }
 0x158   : > { %v850_v24 = vpop.permute.xlu0 %849 }
 0x159   : > { %v852_v25 = vpop.permute.xlu1 %851  ;;  %v1130_v36 = vsel %vm1104_vm8, %v1097_v39, %v850_v24 }
 0x15a   : > { %v1132_v27 = vsel %vm1104_vm8, %v1099_v40, %v852_v25 }
 0x15c   : > { %v897_v32 = vpop.permute.xlu0 %896 }
 0x15d   : > { %v899_v33 = vpop.permute.xlu1 %898  ;;  %v1163_v37 = vsel %vm1137_vm9, %v1130_v36, %v897_v32 }
 0x15e   : > { %v1165_v14 = vsel %vm1137_vm9, %v1132_v27, %v899_v33 }
 0x160   : > { %v932_v0 = vpop.permute.xlu0 %931 }
 0x161   : > { %v617_v49 = vpop.permute.xlu1 %616  ;;  %v1196_v48 = vsel %vm1170_vm10, %v1163_v37, %v932_v0 }
 0x162   : > { %2098 = vmatprep.mubr.msk.bf16.mxu1 %vm1223_vm11, %v1196_v48  ;;  %v969_v59 = vsel %vm939_vm3, %v2561_v11, %v617_v49 }
 0x164   : > { %v934_v41 = vpop.permute.xlu0 %933 }
 0x165   : > { %v619_v42 = vpop.permute.xlu1 %618  ;;  %v1198_v43 = vsel %vm1170_vm10, %v1165_v14, %v934_v41 }
 0x166   : > { %v2733_v44 = vpop.f32.mrf.mxu0  ;;  %2099 = vmatmul.mubr.msk.bf16.gmra.mxu1 %vm1223_vm11, %v1198_v43  ;;  %v971_v61 = vsel %vm939_vm3, %v2574_v29, %v619_v42 }
 0x168   : > { %v2736_v45 = vpop.f32.mrf.mxu0  ;;  %v698_v46 = vpop.permute.xlu0 %697 }
 0x169   : > { %v700_v47 = vpop.permute.xlu1 %699  ;;  %v1002_v62 = vsel %vm972_vm4, %v969_v59, %v698_v46 }
 0x16a   : > { %v2743_v50 = vpop.f32.mrf.mxu0  ;;  %v1004_v9 = vsel %vm972_vm4, %v971_v61, %v700_v47 }
 0x16b   : > { %v1962_v30 = vpack.c.bf16 %v2743_v50, %v2733_v44 }
 0x16c   : > { %v2747_v60 = vpop.f32.mrf.mxu0  ;;  %v735_v51 = vpop.permute.xlu0 %734 }
 0x16d   : > { %2034 = vst [vmem:[%s2741_s12 + $0x8] sm:$0xff] %v1962_v30   ;;  %v737_v23 = vpop.permute.xlu1 %736  ;;  %v1957_v52 = vpack.c.bf16 %v2747_v60, %v2736_v45  ;;  %v1035_v63 = vsel %vm1005_vm5, %v1002_v62, %v735_v51  ;;  %v1581_v14 = vadd.f32 %v2747_v60, %v2736_v45 }
 0x16e   : > { %v1037_v4 = vsel %vm1005_vm5, %v1004_v9, %v737_v23 }
 0x16f   : > { %1958 = vst [vmem:[%s2741_s12] sm:$0xff] %v1957_v52   ;;  %v1582_v41 = vadd.f32 %v2733_v44, %v1581_v14 }
 0x170   : > { %v782_v53 = vpop.permute.xlu0 %781 }
 0x171   : > { %v784_v54 = vpop.permute.xlu1 %783  ;;  %v1068_v5 = vsel %vm1038_vm6, %v1035_v63, %v782_v53  ;;  %v1583_v42 = vadd.f32 %v2743_v50, %v1582_v41 }
 0x172   : > { %v1070_v28 = vsel %vm1038_vm6, %v1037_v4, %v784_v54 }
 0x174   : > { %v817_v55 = vpop.permute.xlu0 %816 }
 0x175   : > { %v819_v56 = vpop.permute.xlu1 %818  ;;  %v1101_v7 = vsel %vm1071_vm7, %v1068_v5, %v817_v55 }
 0x176   : > { %v1103_v11 = vsel %vm1071_vm7, %v1070_v28, %v819_v56 }
 0x178   : > { %v854_v57 = vpop.permute.xlu0 %853 }
 0x179   : > { %v856_v58 = vpop.permute.xlu1 %855  ;;  %v1134_v29 = vsel %vm1104_vm8, %v1101_v7, %v854_v57 }
 0x17a   : > { %v1136_v8 = vsel %vm1104_vm8, %v1103_v11, %v856_v58 }
 0x17c   : > { %v901_v2 = vpop.permute.xlu0 %900 }
 0x17d   : > { %v903_v6 = vpop.permute.xlu1 %902  ;;  %v1167_v13 = vsel %vm1137_vm9, %v1134_v29, %v901_v2 }
 0x17e   : > { %v1169_v12 = vsel %vm1137_vm9, %v1136_v8, %v903_v6 }
 0x180   : > { %v936_v15 = vpop.permute.xlu0 %935 }
 0x181   : > { %v938_v16 = vpop.permute.xlu1 %937  ;;  %v1200_v17 = vsel %vm1170_vm10, %v1167_v13, %v936_v15 }
 0x182   : > { %v1202_v18 = vsel %vm1170_vm10, %v1169_v12, %v938_v16  ;;  %2102 = vmatprep.mubr.msk.bf16.mxu1 %vm1223_vm11, %v1200_v17 }
 0x183   : > { %2103 = vmatmul.mubr.msk.bf16.gmra.mxu1 %vm1223_vm11, %v1202_v18 }
 0x186   : > { %v2773_v19 = vpop.f32.mrf.mxu0 }
 0x188   : > { %v2775_v20 = vpop.f32.mrf.mxu0 }
 0x189   : > { %v1584_v43 = vadd.f32 %v1583_v42, %v2775_v20 }
 0x18a   : > { %v2777_v21 = vpop.f32.mrf.mxu0 }
 0x18b   : > { %v1972_v22 = vpack.c.bf16 %v2777_v21, %v2773_v19 }
 0x18c   : > { %v2781_v24 = vpop.f32.mrf.mxu0 }
 0x18d   : > { %2036 = vst [vmem:[%s2741_s12 + $0x18] sm:$0xff] %v1972_v22   ;;  %v1967_v25 = vpack.c.bf16 %v2781_v24, %v2775_v20  ;;  %v1585_v46 = vadd.f32 %v1584_v43, %v2781_v24 }
 0x18f   : > { %2035 = vst [vmem:[%s2741_s12 + $0x10] sm:$0xff] %v1967_v25   ;;  %v1586_v47 = vadd.f32 %v2773_v19, %v1585_v46 }
 0x191   : > { %v1587_v23 = vadd.f32 %v2777_v21, %v1586_v47 }
 0x1a6   : > { %v2787_v26 = vpop.f32.mrf.mxu0 }
 0x1a8   : > { %v2789_v3 = vpop.f32.mrf.mxu0 }
 0x1a9   : > { %v1588_v54 = vadd.f32 %v1587_v23, %v2789_v3 }
 0x1aa   : > { %v2791_v31 = vpop.f32.mrf.mxu0 }
 0x1ab   : > { %v1982_v32 = vpack.c.bf16 %v2791_v31, %v2787_v26 }
 0x1ac   : > { %v2795_v1 = vpop.f32.mrf.mxu0 }
 0x1ad   : > { %2038 = vst [vmem:[%s2741_s12 + $0x28] sm:$0xff] %v1982_v32   ;;  %v1977_v33 = vpack.c.bf16 %v2795_v1, %v2789_v3  ;;  %v1589_v57 = vadd.f32 %v1588_v54, %v2795_v1 }
 0x1af   : > { %2037 = vst [vmem:[%s2741_s12 + $0x20] sm:$0xff] %v1977_v33   ;;  %v1590_v58 = vadd.f32 %v2787_v26, %v1589_v57 }
 0x1b1   : > { %v1591_v59 = vadd.f32 %v2791_v31, %v1590_v58 }
 0x1c6   : > { %v2801_v34 = vpop.f32.mrf.mxu0 }
 0x1c8   : > { %v2803_v39 = vpop.f32.mrf.mxu0 }
 0x1c9   : > { %v1592_v61 = vadd.f32 %v1591_v59, %v2803_v39 }
 0x1ca   : > { %v2805_v35 = vpop.f32.mrf.mxu0 }
 0x1cb   : > { %v1992_v36 = vpack.c.bf16 %v2805_v35, %v2801_v34 }
 0x1cc   : > { %v2809_v10 = vpop.f32.mrf.mxu0 }
 0x1cd   : > { %2040 = vst [vmem:[%s2741_s12 + $0x38] sm:$0xff] %v1992_v36   ;;  %v1987_v37 = vpack.c.bf16 %v2809_v10, %v2803_v39  ;;  %v1593_v62 = vadd.f32 %v1592_v61, %v2809_v10 }
 0x1cf   : > { %2039 = vst [vmem:[%s2741_s12 + $0x30] sm:$0xff] %v1987_v37   ;;  %v1594_v9 = vadd.f32 %v2801_v34, %v1593_v62 }
 0x1d1   : > { %v1595_v63 = vadd.f32 %v2805_v35, %v1594_v9 }
 0x1e6   : > { %v2815_v0 = vpop.f32.mrf.mxu1 }
 0x1e8   : > { %v2817_v38 = vpop.f32.mrf.mxu1 }
 0x1e9   : > { %v1596_v2 = vadd.f32 %v1595_v63, %v2817_v38 }
 0x1ea   : > { %v2819_v49 = vpop.f32.mrf.mxu1 }
 0x1eb   : > { %v2002_v48 = vpack.c.bf16 %v2819_v49, %v2815_v0 }
 0x1ec   : > { %v2823_v40 = vpop.f32.mrf.mxu1 }
 0x1ed   : > { %2042 = vst [vmem:[%s2741_s12 + $0x48] sm:$0xff] %v2002_v48   ;;  %v1997_v27 = vpack.c.bf16 %v2823_v40, %v2817_v38  ;;  %v1597_v4 = vadd.f32 %v1596_v2, %v2823_v40 }
 0x1ef   : > { %2041 = vst [vmem:[%s2741_s12 + $0x40] sm:$0xff] %v1997_v27   ;;  %v1598_v28 = vadd.f32 %v2815_v0, %v1597_v4 }
 0x1f1   : > { %v1599_v13 = vadd.f32 %v2819_v49, %v1598_v28 }
 0x206   : > { %v2836_v30 = vpop.f32.mrf.mxu1 }
 0x208   : > { %v2838_v51 = vpop.f32.mrf.mxu1 }
 0x209   : > { %v1600_v15 = vadd.f32 %v1599_v13, %v2838_v51 }
 0x20a   : > { %v2841_v52 = vpop.f32.mrf.mxu1 }
 0x20b   : > { %v2012_v53 = vpack.c.bf16 %v2841_v52, %v2836_v30 }
 0x20c   : > { %v2846_v55 = vpop.f32.mrf.mxu1 }
 0x20d   : > { %2044 = vst [vmem:[%s2741_s12 + $0x58] sm:$0xff] %v2012_v53   ;;  %v2007_v56 = vpack.c.bf16 %v2846_v55, %v2838_v51  ;;  %v1601_v12 = vadd.f32 %v1600_v15, %v2846_v55 }
 0x20f   : > { %2043 = vst [vmem:[%s2741_s12 + $0x50] sm:$0xff] %v2007_v56   ;;  %v1602_v16 = vadd.f32 %v2836_v30, %v1601_v12 }
 0x211   : > { %v1603_v17 = vadd.f32 %v2841_v52, %v1602_v16 }
 0x226   : > { %v2861_v5 = vpop.f32.mrf.mxu1 }
 0x228   : > { %v2863_v6 = vpop.f32.mrf.mxu1 }
 0x229   : > { %v1604_v18 = vadd.f32 %v1603_v17, %v2863_v6 }
 0x22a   : > { %v2866_v7 = vpop.f32.mrf.mxu1 }
 0x22b   : > { %v2022_v11 = vpack.c.bf16 %v2866_v7, %v2861_v5 }
 0x22c   : > { %v2870_v29 = vpop.f32.mrf.mxu1 }
 0x22d   : > { %2046 = vst [vmem:[%s2741_s12 + $0x68] sm:$0xff] %v2022_v11   ;;  %v2017_v8 = vpack.c.bf16 %v2870_v29, %v2863_v6  ;;  %v1605_v22 = vadd.f32 %v1604_v18, %v2870_v29 }
 0x22f   : > { %2045 = vst [vmem:[%s2741_s12 + $0x60] sm:$0xff] %v2017_v8   ;;  %v1606_v25 = vadd.f32 %v2861_v5, %v1605_v22 }
 0x231   : > { %v1607_v36 = vadd.f32 %v2866_v7, %v1606_v25 }
 0x243   : > { %v2884_v32 = vpop.f32.mrf.mxu1 }
 0x245   : > { %v2886_v33 = vpop.f32.mrf.mxu1 }
 0x246   : > { %v1608_v48 = vadd.f32 %v1607_v36, %v2886_v33 }
 0x247   : > { %v2889_v37 = vpop.f32.mrf.mxu1 }
 0x248   : > { %v2032_v27 = vpack.c.bf16 %v2889_v37, %v2884_v32 }
 0x249   : > { %v2894_v14 = vpop.f32.mrf.mxu1 }
 0x24a   : > { %2048 = vst [vmem:[%s2741_s12 + $0x78] sm:$0xff] %v2032_v27   ;;  %v2027_v41 = vpack.c.bf16 %v2894_v14, %v2886_v33  ;;  %v1609_v42 = vadd.f32 %v1608_v48, %v2894_v14 }
 0x24c   : > { %2047 = vst [vmem:[%s2741_s12 + $0x70] sm:$0xff] %v2027_v41   ;;  %v1610_v43 = vadd.f32 %v2884_v32, %v1609_v42 }
 0x24e   : > { %v1611_v46 = vadd.f32 %v2889_v37, %v1610_v43 }
 0x250   : > { %v1612_v47 = vrot.slane %v1611_v46, 4 }
 0x252   : > { %v1613_v23 = vadd.f32 %v1612_v47, %v1611_v46 }
 0x254   : > { %v1614_v53 = vrot.slane %v1613_v23, 2 }
 0x256   : > { %v1615_v54 = vadd.f32 %v1614_v53, %v1613_v23 }
 0x258   : > { %v1616_v56 = vrot.slane %v1615_v54, 1 }
 0x25a   : > { %v1617_v57 = vadd.f32 %v1616_v56, %v1615_v54 }
 0x25c   : > { %1651 = vst [vmem:[%s2907_s20] sm:$0x1] %v1617_v57  ;;  %v2910_v58 = vmul.f32 0.00390625, %v1617_v57 }
 0x25e   : > { %v1619_v59 = vsub.f32 %v2736_v45, %v2910_v58  ;;  %v1620_v61 = vsub.f32 %v2747_v60, %v2910_v58  ;;  %v1621_v62 = vsub.f32 %v2733_v44, %v2910_v58  ;;  %v1622_v2 = vsub.f32 %v2743_v50, %v2910_v58 }
 0x25f   : > { %v1623_v4 = vsub.f32 %v2775_v20, %v2910_v58  ;;  %v1624_v8 = vsub.f32 %v2781_v24, %v2910_v58  ;;  %v1625_v60 = vsub.f32 %v2773_v19, %v2910_v58  ;;  %v1626_v12 = vsub.f32 %v2777_v21, %v2910_v58 }
 0x260   : > { %v1652_v9 = vmul.f32 %v1619_v59, %v1619_v59  ;;  %v1653_v63 = vmul.f32 %v1620_v61, %v1620_v61  ;;  %v1654_v28 = vmul.f32 %v1621_v62, %v1621_v62  ;;  %v1655_v45 = vmul.f32 %v1622_v2, %v1622_v2 }
 0x261   : > { %v1656_v15 = vmul.f32 %v1623_v4, %v1623_v4  ;;  %v1657_v16 = vmul.f32 %v1624_v8, %v1624_v8  ;;  %v1627_v20 = vsub.f32 %v2789_v3, %v2910_v58  ;;  %v1658_v17 = vmul.f32 %v1625_v60, %v1625_v60 }
 0x262   : > { %v1684_v11 = vadd.f32 %v1653_v63, %v1652_v9  ;;  %v1628_v24 = vsub.f32 %v2795_v1, %v2910_v58  ;;  %v1659_v22 = vmul.f32 %v1626_v12, %v1626_v12  ;;  %v1629_v19 = vsub.f32 %v2787_v26, %v2910_v58 }
 0x263   : > { %v1660_v36 = vmul.f32 %v1627_v20, %v1627_v20  ;;  %v1630_v21 = vsub.f32 %v2791_v31, %v2910_v58  ;;  %v1631_v3 = vsub.f32 %v2803_v39, %v2910_v58  ;;  %v1632_v1 = vsub.f32 %v2809_v10, %v2910_v58 }
 0x264   : > { %v1685_v13 = vadd.f32 %v1684_v11, %v1654_v28  ;;  %v1661_v27 = vmul.f32 %v1628_v24, %v1628_v24  ;;  %v1662_v42 = vmul.f32 %v1629_v19, %v1629_v19  ;;  %v1633_v26 = vsub.f32 %v2801_v34, %v2910_v58 }
 0x265   : > { %v1663_v46 = vmul.f32 %v1630_v21, %v1630_v21  ;;  %v1664_v23 = vmul.f32 %v1631_v3, %v1631_v3  ;;  %v1634_v31 = vsub.f32 %v2805_v35, %v2910_v58  ;;  %v1665_v54 = vmul.f32 %v1632_v1, %v1632_v1 }
 0x266   : > { %v1686_v44 = vadd.f32 %v1685_v13, %v1655_v45  ;;  %v1635_v39 = vsub.f32 %v2817_v38, %v2910_v58  ;;  %v1666_v57 = vmul.f32 %v1633_v26, %v1633_v26  ;;  %v1636_v10 = vsub.f32 %v2823_v40, %v2910_v58 }
 0x267   : > { %v1667_v61 = vmul.f32 %v1634_v31, %v1634_v31  ;;  %v1637_v34 = vsub.f32 %v2815_v0, %v2910_v58  ;;  %v1638_v35 = vsub.f32 %v2819_v49, %v2910_v58  ;;  %v1639_v38 = vsub.f32 %v2838_v51, %v2910_v58 }
 0x268   : > { %v1687_v50 = vadd.f32 %v1686_v44, %v1656_v15  ;;  %v1668_v9 = vmul.f32 %v1635_v39, %v1635_v39  ;;  %v1669_v2 = vmul.f32 %v1636_v10, %v1636_v10  ;;  %v1640_v40 = vsub.f32 %v2846_v55, %v2910_v58 }
 0x269   : > { %v1670_v28 = vmul.f32 %v1637_v34, %v1637_v34  ;;  %v1671_v8 = vmul.f32 %v1638_v35, %v1638_v35  ;;  %v1641_v0 = vsub.f32 %v2836_v30, %v2910_v58  ;;  %v1672_v13 = vmul.f32 %v1639_v38, %v1639_v38 }
 0x26a   : > { %v1688_v18 = vadd.f32 %v1687_v50, %v1657_v16  ;;  %v1642_v49 = vsub.f32 %v2841_v52, %v2910_v58  ;;  %v1673_v15 = vmul.f32 %v1640_v40, %v1640_v40  ;;  %v1643_v51 = vsub.f32 %v2863_v6, %v2910_v58 }
 0x26b   : > { %v1674_v12 = vmul.f32 %v1641_v0, %v1641_v0  ;;  %v1644_v55 = vsub.f32 %v2870_v29, %v2910_v58  ;;  %v1645_v30 = vsub.f32 %v2861_v5, %v2910_v58  ;;  %v1646_v52 = vsub.f32 %v2866_v7, %v2910_v58 }
 0x26c   : > { %v1689_v25 = vadd.f32 %v1688_v18, %v1658_v17  ;;  %v1675_v50 = vmul.f32 %v1642_v49, %v1642_v49  ;;  %v1676_v17 = vmul.f32 %v1643_v51, %v1643_v51  ;;  %v1647_v6 = vsub.f32 %v2886_v33, %v2910_v58 }
 0x26d   : > { %v1677_v24 = vmul.f32 %v1644_v55, %v1644_v55  ;;  %v1648_v29 = vsub.f32 %v2894_v14, %v2910_v58  ;;  %v1649_v5 = vsub.f32 %v2884_v32, %v2910_v58  ;;  %v1650_v7 = vsub.f32 %v2889_v37, %v2910_v58 }
 0x26e   : > { %v1690_v48 = vadd.f32 %v1689_v25, %v1659_v22  ;;  %v1678_v25 = vmul.f32 %v1645_v30, %v1645_v30  ;;  %v1680_v21 = vmul.f32 %v1647_v6, %v1647_v6 }
 0x270   : > { %v1691_v41 = vadd.f32 %v1690_v48, %v1660_v36  ;;  %v1679_v36 = vmul.f32 %v1646_v52, %v1646_v52 }
 0x272   : > { %v1692_v43 = vadd.f32 %v1691_v41, %v1661_v27  ;;  %v1681_v41 = vmul.f32 %v1648_v29, %v1648_v29 }
 0x274   : > { %v1693_v47 = vadd.f32 %v1692_v43, %v1662_v42  ;;  %v1682_v42 = vmul.f32 %v1649_v5, %v1649_v5  ;;  %v1683_v43 = vmul.f32 %v1650_v7, %v1650_v7 }
 0x276   : > { %v1694_v53 = vadd.f32 %v1693_v47, %v1663_v46 }
 0x278   : > { %v1695_v56 = vadd.f32 %v1694_v53, %v1664_v23 }
 0x27a   : > { %v1696_v59 = vadd.f32 %v1695_v56, %v1665_v54 }
 0x27c   : > { %v1697_v62 = vadd.f32 %v1696_v59, %v1666_v57 }
 0x27e   : > { %v1698_v63 = vadd.f32 %v1697_v62, %v1667_v61 }
 0x280   : > { %v1699_v4 = vadd.f32 %v1698_v63, %v1668_v9 }
 0x282   : > { %v1700_v11 = vadd.f32 %v1699_v4, %v1669_v2 }
 0x284   : > { %v1701_v45 = vadd.f32 %v1700_v11, %v1670_v28 }
 0x286   : > { %v1702_v60 = vadd.f32 %v1701_v45, %v1671_v8 }
 0x288   : > { %v1703_v44 = vadd.f32 %v1702_v60, %v1672_v13 }
 0x28a   : > { %v1704_v16 = vadd.f32 %v1703_v44, %v1673_v15 }
 0x28c   : > { %v1705_v20 = vadd.f32 %v1704_v16, %v1674_v12 }
 0x28e   : > { %v1706_v18 = vadd.f32 %v1705_v20, %v1675_v50 }
 0x290   : > { %v1707_v22 = vadd.f32 %v1706_v18, %v1676_v17 }
 0x292   : > { %v1708_v19 = vadd.f32 %v1707_v22, %v1677_v24 }
 0x294   : > { %v1709_v48 = vadd.f32 %v1708_v19, %v1678_v25 }
 0x296   : > { %v1710_v27 = vadd.f32 %v1709_v48, %v1679_v36 }
 0x298   : > { %v1711_v3 = vadd.f32 %v1710_v27, %v1680_v21 }
 0x29a   : > { %v1712_v33 = vadd.f32 %v1711_v3, %v1681_v41 }
 0x29c   : > { %v1713_v1 = vadd.f32 %v1712_v33, %v1682_v42 }
 0x29e   : > { %v1714_v46 = vadd.f32 %v1713_v1, %v1683_v43 }
 0x2a0   : > { %v1715_v47 = vrot.slane %v1714_v46, 4 }
 0x2a2   : > { %v1716_v14 = vadd.f32 %v1715_v47, %v1714_v46 }
 0x2a4   : > { %v1717_v26 = vrot.slane %v1716_v14, 2 }
 0x2a6   : > { %v1718_v23 = vadd.f32 %v1717_v26, %v1716_v14 }
 0x2a8   : > { %v1719_v53 = vrot.slane %v1718_v23, 1 }
 0x2aa   : > { %v1720_v31 = vadd.f32 %v1719_v53, %v1718_v23 }
 0x2ac   : > { %1721 = vst [vmem:[%s2907_s20 + $0x1] sm:$0x1] %v1720_v31 }
 0x2ad PF: > { %s14_s14 = sadd.s32 1, %s2208_s14   ;;  %s2990_s12 = smov %s2204_s13 }
 0x2ae   : > { %p11_p6 = scmp.ge.s32.totalorder %s14_s14, 4   ;;  %s2991_s13 = smov %s2993_s15 }
 0x2b0   :  { %13 = sbr.rel (!%p11_p6) target bundleno = 2 (0x2), region = 70 }

</bundles_post_ra>
